<compile_context>
chip_gen: v7x
topology: tpu7x:2x2x1
jax: 0.10.0
libtpu: 0.0.40
codegen_flags: <defaults>
</compile_context>

<pallas_src>
import jax
import jax.numpy as jnp
from jax.experimental import pallas as pl
from jax.experimental.pallas import tpu as pltpu


def _round_up(x, m):
    return ((x + m - 1) // m) * m


def _physical_vmem_bytes():
    """Best-effort physical VMEM size; conservative (v7x-sized) fallback."""
    try:
        info = pltpu.get_tpu_info()
        for attr in ("vmem_capacity_bytes", "vmem_bytes", "vmem_size_bytes"):
            v = getattr(info, attr, None)
            if v:
                return int(v)
    except Exception:
        pass
    return 64 * 1024 * 1024


def _device_kind():
    try:
        return jax.devices()[0].device_kind.lower()
    except Exception:
        return ""


def _select_tb(B, kind):
    # v5e already sits at its compute/memory balance at tb=256; v6e wants a
    # larger batch tile (balance ~680 FLOP/byte on the W1 stream); v7x wants
    # ~512 plus at least two batch tiles so the "parallel" batch axis can be
    # sharded across its two TensorCores.
    tb_target = 256 if "v5" in kind else 512
    tb = max(8, _round_up(min(tb_target, _round_up(B, 8)), 8))
    if "v7" in kind and B > 8 and _round_up(B, tb) // tb < 2:
        tb = max(8, _round_up((B + 1) // 2, 8))
    return tb


# ---------------------------------------------------------------------------
# Kernel: fused fc1 (K-tiled) -> ReLU -> fc2 -> ReLU -> fc3 -> log_softmax.
# Grid = (batch tiles [parallel], K tiles over input_size [arbitrary]).
# ---------------------------------------------------------------------------
def mlp_kernel(x_ref, w1_ref, b1_ref, w2_ref, b2_ref, w3_ref, b3_ref,
               o_ref, acc_ref):
    k = pl.program_id(1)

    @pl.when(k == 0)
    def _():
        acc_ref[...] = jnp.zeros_like(acc_ref)

    # fc1 partial product for this K slab.  x arrives as f32 and is cast to
    # bf16 on the VPU (effectively free) so the wrapper never materializes a
    # bf16 copy of x in HBM.
    acc_ref[...] += jnp.dot(x_ref[...].astype(jnp.bfloat16), w1_ref[...],
                            preferred_element_type=jnp.float32)

    @pl.when(k == pl.num_programs(1) - 1)
    def _():
        # fc1 bias + ReLU (dropout p=0.0 -> identity).
        h1 = jnp.maximum(acc_ref[...] + b1_ref[...], 0.0).astype(w2_ref.dtype)
        # fc2 + ReLU
        h2 = jnp.dot(h1, w2_ref[...],
                     preferred_element_type=jnp.float32) + b2_ref[...]
        h2 = jnp.maximum(h2, 0.0).astype(w3_ref.dtype)
        # fc3 (class dim padded to a lane-dense 128; padded bias = -1e30)
        logits = jnp.dot(h2, w3_ref[...],
                         preferred_element_type=jnp.float32) + b3_ref[...]
        # Numerically stable log-softmax; padded lanes contribute exp(-1e30)=0,
        # so the normalizer over the real classes is unchanged.
        m = jnp.max(logits, axis=-1, keepdims=True)
        lse = jnp.log(jnp.sum(jnp.exp(logits - m), axis=-1, keepdims=True)) + m
        o_ref[...] = (logits - lse).astype(o_ref.dtype)


# ---------------------------------------------------------------------------
# One-time parameter preparation (hoisted out of the per-call path).
# ---------------------------------------------------------------------------
def prepare_params(params, *, tk=1024):
    """Convert weights to bf16, pad the class dim to 128 lanes (zero weight
    columns, -1e30 bias), and zero-pad fc1's K axis to a multiple of tk so W1
    can always be streamed in (tk, H1) slabs (no tk=Din fallback)."""
    w1, b1, w2, b2, w3, b3 = params
    Din, H1 = w1.shape
    H2 = w2.shape[1]
    C = w3.shape[1]

    tk = _round_up(max(128, int(tk)), 128)        # x's last block dim needs %128
    tk = min(tk, _round_up(Din, 128))
    din_pad = _round_up(Din, tk)

    w1_bf = w1.astype(jnp.bfloat16)
    if din_pad != Din:
        w1_bf = jnp.pad(w1_bf, ((0, din_pad - Din), (0, 0)))  # zeros: no-op in acc
    w2_bf = w2.astype(jnp.bfloat16)
    w3_bf = w3.astype(jnp.bfloat16)
    b1_f = b1.astype(jnp.float32).reshape(1, H1)
    b2_f = b2.astype(jnp.float32).reshape(1, H2)
    b3_f = b3.astype(jnp.float32).reshape(1, C)

    cp = _round_up(C, 128)
    if cp != C:
        w3_bf = jnp.pad(w3_bf, ((0, 0), (0, cp - C)))
        b3_f = jnp.pad(b3_f, ((0, 0), (0, cp - C)), constant_values=-1e30)

    return dict(w1=w1_bf, b1=b1_f, w2=w2_bf, b2=b2_f, w3=w3_bf, b3=b3_f,
                din=Din, tk=tk, num_classes=C)


# ---------------------------------------------------------------------------
# Forward pass.
# ---------------------------------------------------------------------------
def net_forward(x, prepared, *, tb=None):
    """x: (B, Din) float32; prepared: output of prepare_params()."""
    w1, b1 = prepared["w1"], prepared["b1"]
    w2, b2 = prepared["w2"], prepared["b2"]
    w3, b3 = prepared["w3"], prepared["b3"]
    Din, tk, C = prepared["din"], prepared["tk"], prepared["num_classes"]

    B, din_x = x.shape
    if din_x != Din:
        raise ValueError(f"expected x with {Din} features, got {din_x}")
    din_pad, H1 = w1.shape
    H2 = w2.shape[1]
    Cp = w3.shape[1]

    kind = _device_kind()
    if tb is None:
        tb = _select_tb(B, kind)
    tb = max(8, _round_up(min(tb, _round_up(B, 8)), 8))

    # Zero-pad the batch and (if needed) x's K axis to match W1's K padding.
    B_pad = _round_up(B, tb)
    pad_b, pad_k = B_pad - B, din_pad - Din
    if pad_b or pad_k:
        x = jnp.pad(x, ((0, pad_b), (0, pad_k)))

    grid = (B_pad // tb, din_pad // tk)

    # Generation-aware VMEM budget: ~100 MiB on 128-MiB parts (v5e/v6e),
    # ~56 MiB on v7x (64 MiB physical, keep compiler-scratch headroom).
    vmem_limit = int(min(_physical_vmem_bytes() - 8 * 1024 * 1024,
                         100 * 1024 * 1024))

    # Advisory cost estimate for XLA's scheduler around the custom call.
    flops = 2 * B_pad * (din_pad * H1 + H1 * H2 + H2 * Cp)
    bytes_accessed = int(x.size * 4                    # x streamed once (f32)
                         + grid[0] * w1.size * 2       # W1 re-read per batch tile
                         + w2.size * 2 + w3.size * 2   # W2 / W3 read once
                         + B_pad * Cp * 4)             # output
    cost = pl.CostEstimate(flops=flops, transcendentals=B_pad * Cp,
                           bytes_accessed=bytes_accessed)

    def build_call(single_buffer_consts):
        # Grid-invariant operands (constant index_map): double-buffering only
        # wastes VMEM (~8 MiB for W2 at full scale), so single-buffer them.
        kw = {"pipeline_mode": pl.Buffered(1)} if single_buffer_consts else {}
        return pl.pallas_call(
            mlp_kernel,
            out_shape=jax.ShapeDtypeStruct((B_pad, Cp), jnp.float32),
            grid_spec=pltpu.PrefetchScalarGridSpec(
                num_scalar_prefetch=0,
                grid=grid,                                         # reduction axis last
                in_specs=[
                    pl.BlockSpec((tb, tk), lambda i, k: (i, k)),   # x (f32, cast in kernel)
                    pl.BlockSpec((tk, H1), lambda i, k: (k, 0)),   # W1 K-slab (streamed)
                    pl.BlockSpec((1, H1), lambda i, k: (0, 0), **kw),    # b1
                    pl.BlockSpec((H1, H2), lambda i, k: (0, 0), **kw),   # W2
                    pl.BlockSpec((1, H2), lambda i, k: (0, 0), **kw),    # b2
                    pl.BlockSpec((H2, Cp), lambda i, k: (0, 0), **kw),   # W3
                    pl.BlockSpec((1, Cp), lambda i, k: (0, 0), **kw),    # b3
                ],
                out_specs=pl.BlockSpec((tb, Cp), lambda i, k: (i, 0)),
                scratch_shapes=[pltpu.VMEM((tb, H1), jnp.float32)],  # fc1 f32 accumulator
            ),
            compiler_params=pltpu.CompilerParams(
                dimension_semantics=("parallel", "arbitrary"),
                vmem_limit_bytes=vmem_limit,
            ),
            cost_estimate=cost,
        )

    try:
        out = build_call(True)(x, w1, b1, w2, b2, w3, b3)
    except Exception:
        # Conservative fallback if Buffered(1) single-buffering is rejected.
        out = build_call(False)(x, w1, b1, w2, b2, w3, b3)

    return out[:B, :C]


# ---------------------------------------------------------------------------
# Test harness
# ---------------------------------------------------------------------------
def init_params(key, input_size, h1, h2, num_classes):
    k1, k2, k3, k4, k5, k6 = jax.random.split(key, 6)
    # Deterministic synthetic init; weights stored (in, out).
    w1 = jax.random.normal(k1, (input_size, h1), jnp.float32) * 0.02
    b1 = jax.random.normal(k2, (1, h1), jnp.float32) * 0.02
    w2 = jax.random.normal(k3, (h1, h2), jnp.float32) * 0.02
    b2 = jax.random.normal(k4, (1, h2), jnp.float32) * 0.02
    w3 = jax.random.normal(k5, (h2, num_classes), jnp.float32) * 0.02
    b3 = jax.random.normal(k6, (1, num_classes), jnp.float32) * 0.02
    return (w1, b1, w2, b2, w3, b3)


def reference_forward(x, params):
    """Pure-JAX reference using the same bf16-weight / f32-accumulate recipe."""
    w1, b1, w2, b2, w3, b3 = params
    xb = x.astype(jnp.bfloat16)
    h1 = jnp.maximum(
        jnp.dot(xb, w1.astype(jnp.bfloat16),
                preferred_element_type=jnp.float32) + b1, 0.0
    ).astype(jnp.bfloat16)
    h2 = jnp.maximum(
        jnp.dot(h1, w2.astype(jnp.bfloat16),
                preferred_element_type=jnp.float32) + b2, 0.0
    ).astype(jnp.bfloat16)
    logits = jnp.dot(h2, w3.astype(jnp.bfloat16),
                     preferred_element_type=jnp.float32) + b3
    return jax.nn.log_softmax(logits, axis=-1)


if __name__ == "__main__":
    # Small shapes consistent with the module's structure
    # (full-size module: input_size=32768, h1=4096, h2=1024, num_classes=10).
    batch = 16
    input_size = 512
    h1_dim = 256
    h2_dim = 128
    num_classes = 10

    key = jax.random.PRNGKey(0)
    kx, kp = jax.random.split(key)
    x = jax.random.normal(kx, (batch, input_size), jnp.float32)
    params = init_params(kp, input_size, h1_dim, h2_dim, num_classes)
    ref = reference_forward(x, params)

    # (1) Small tiles: exercises multiple batch tiles AND multiple K steps.
    prep_small = prepare_params(params, tk=128)
    out_small = jax.block_until_ready(net_forward(x, prep_small, tb=8))
    assert out_small.shape == (batch, num_classes)
    assert jnp.allclose(out_small, ref, atol=1e-2, rtol=1e-2), "small-tile mismatch"

    # (2) Non-divisible K tile: exercises the zero-padded K axis (din_pad=768).
    prep_pad = prepare_params(params, tk=384)
    out_pad = jax.block_until_ready(net_forward(x, prep_pad, tb=8))
    assert jnp.allclose(out_pad, ref, atol=1e-2, rtol=1e-2), "K-pad mismatch"

    # (3) Production path: generation-aware tb / tk / vmem limit defaults.
    prep_auto = prepare_params(params)
    out_auto = jax.block_until_ready(net_forward(x, prep_auto))
    assert out_auto.shape == (batch, num_classes)
    assert jnp.allclose(out_auto, ref, atol=1e-2, rtol=1e-2), "auto-tile mismatch"

    print("KERNEL_OK")
</pallas_src>

<mosaic_0001>
module attributes {stable_mosaic.version = 11 : i64} {
  func.func @mlp_kernel(%arg0: i32, %arg1: i32, %arg2: memref<8x128xf32, #tpu.memory_space<vmem>>, %arg3: memref<128x256xbf16, #tpu.memory_space<vmem>>, %arg4: memref<1x256xf32, #tpu.memory_space<vmem>>, %arg5: memref<256x128xbf16, #tpu.memory_space<vmem>>, %arg6: memref<1x128xf32, #tpu.memory_space<vmem>>, %arg7: memref<128x128xbf16, #tpu.memory_space<vmem>>, %arg8: memref<1x128xf32, #tpu.memory_space<vmem>>, %arg9: memref<8x128xf32, #tpu.memory_space<vmem>>, %arg10: memref<8x256xf32, #tpu.memory_space<vmem>>) attributes {dimension_semantics = [#tpu.dimension_semantics<parallel>, #tpu.dimension_semantics<arbitrary>], iteration_bounds = array<i64: 2, 4>, scalar_prefetch = 0 : i64, scratch_operands = 1 : i64, tpu.core_type = #tpu.core_type<tc>, window_params = [{transform_indices = @transform_0, window_bounds = array<i64: 8, 128>}, {transform_indices = @transform_1, window_bounds = array<i64: 128, 256>}, {pipeline_mode = #tpu.pipeline_mode<synchronous>, transform_indices = @transform_2, window_bounds = array<i64: 1, 256>}, {pipeline_mode = #tpu.pipeline_mode<synchronous>, transform_indices = @transform_3, window_bounds = array<i64: 256, 128>}, {pipeline_mode = #tpu.pipeline_mode<synchronous>, transform_indices = @transform_4, window_bounds = array<i64: 1, 128>}, {pipeline_mode = #tpu.pipeline_mode<synchronous>, transform_indices = @transform_5, window_bounds = array<i64: 128, 128>}, {pipeline_mode = #tpu.pipeline_mode<synchronous>, transform_indices = @transform_6, window_bounds = array<i64: 1, 128>}, {transform_indices = @transform_7, window_bounds = array<i64: 8, 128>}]} {
    %c0_i32 = arith.constant 0 : i32
    %0 = arith.cmpi eq, %arg1, %c0_i32 : i32
    %1 = arith.extui %0 : i1 to i32
    %c0_i32_0 = arith.constant 0 : i32
    %2 = arith.cmpi ne, %1, %c0_i32_0 : i32
    scf.if %2 {
      %cst_9 = arith.constant 0.000000e+00 : f32
      %13 = vector.broadcast %cst_9 : f32 to vector<8x256xf32>
      %c0_10 = arith.constant 0 : index
      %c0_11 = arith.constant 0 : index
      %14 = vector.load %arg10[%c0_10, %c0_11] : memref<8x256xf32, #tpu.memory_space<vmem>>, vector<8x256xf32>
      tpu.vector_store %arg10[%c0_10, %c0_11], %13 {strides = array<i32>} : memref<8x256xf32, #tpu.memory_space<vmem>>, vector<8x256xf32>,
    } else {
    }
    %c0 = arith.constant 0 : index
    %c0_1 = arith.constant 0 : index
    %3 = vector.load %arg10[%c0, %c0_1] : memref<8x256xf32, #tpu.memory_space<vmem>>, vector<8x256xf32>
    %c0_2 = arith.constant 0 : index
    %c0_3 = arith.constant 0 : index
    %4 = vector.load %arg2[%c0_2, %c0_3] : memref<8x128xf32, #tpu.memory_space<vmem>>, vector<8x128xf32>
    %5 = arith.truncf %4 : vector<8x128xf32> to vector<8x128xbf16>
    %c0_4 = arith.constant 0 : index
    %c0_5 = arith.constant 0 : index
    %6 = vector.load %arg3[%c0_4, %c0_5] : memref<128x256xbf16, #tpu.memory_space<vmem>>, vector<128x256xbf16>
    %cst = arith.constant dense<0.000000e+00> : vector<8x256xf32>
    %7 = tpu.matmul %5, %6, %cst {dimension_numbers = #tpu.dot_dimension_numbers<[1], [0], [0], [1], [0, 0, 1, 1], [], []>} : vector<8x128xbf16>, vector<128x256xbf16>, vector<8x256xf32> -> vector<8x256xf32>
    %8 = arith.addf %3, %7 : vector<8x256xf32>
    %c0_6 = arith.constant 0 : index
    %c0_7 = arith.constant 0 : index
    %9 = vector.load %arg10[%c0_6, %c0_7] : memref<8x256xf32, #tpu.memory_space<vmem>>, vector<8x256xf32>
    tpu.vector_store %arg10[%c0_6, %c0_7], %8 {strides = array<i32>} : memref<8x256xf32, #tpu.memory_space<vmem>>, vector<8x256xf32>,
    %c3_i32 = arith.constant 3 : i32
    %10 = arith.cmpi eq, %arg1, %c3_i32 : i32
    %11 = arith.extui %10 : i1 to i32
    %c0_i32_8 = arith.constant 0 : i32
    %12 = arith.cmpi ne, %11, %c0_i32_8 : i32
    scf.if %12 {
      %c0_9 = arith.constant 0 : index
      %c0_10 = arith.constant 0 : index
      %13 = vector.load %arg10[%c0_9, %c0_10] : memref<8x256xf32, #tpu.memory_space<vmem>>, vector<8x256xf32>
      %c0_11 = arith.constant 0 : index
      %c0_12 = arith.constant 0 : index
      %14 = vector.load %arg4[%c0_11, %c0_12] : memref<1x256xf32, #tpu.memory_space<vmem>>, vector<1x256xf32>
      %15 = vector.broadcast %14 : vector<1x256xf32> to vector<8x256xf32>
      %16 = arith.addf %13, %15 : vector<8x256xf32>
      %cst_13 = arith.constant 0.000000e+00 : f32
      %17 = vector.broadcast %cst_13 : f32 to vector<8x256xf32>
      %18 = arith.maximumf %16, %17 : vector<8x256xf32>
      %19 = arith.truncf %18 : vector<8x256xf32> to vector<8x256xbf16>
      %c0_14 = arith.constant 0 : index
      %c0_15 = arith.constant 0 : index
      %20 = vector.load %arg5[%c0_14, %c0_15] : memref<256x128xbf16, #tpu.memory_space<vmem>>, vector<256x128xbf16>
      %cst_16 = arith.constant dense<0.000000e+00> : vector<8x128xf32>
      %21 = tpu.matmul %19, %20, %cst_16 {dimension_numbers = #tpu.dot_dimension_numbers<[1], [0], [0], [1], [0, 0, 1, 1], [], []>} : vector<8x256xbf16>, vector<256x128xbf16>, vector<8x128xf32> -> vector<8x128xf32>
      %c0_17 = arith.constant 0 : index
      %c0_18 = arith.constant 0 : index
      %22 = vector.load %arg6[%c0_17, %c0_18] : memref<1x128xf32, #tpu.memory_space<vmem>>, vector<1x128xf32>
      %23 = vector.broadcast %22 : vector<1x128xf32> to vector<8x128xf32>
      %24 = arith.addf %21, %23 : vector<8x128xf32>
      %cst_19 = arith.constant 0.000000e+00 : f32
      %25 = vector.broadcast %cst_19 : f32 to vector<8x128xf32>
      %26 = arith.maximumf %24, %25 : vector<8x128xf32>
      %27 = arith.truncf %26 : vector<8x128xf32> to vector<8x128xbf16>
      %c0_20 = arith.constant 0 : index
      %c0_21 = arith.constant 0 : index
      %28 = vector.load %arg7[%c0_20, %c0_21] : memref<128x128xbf16, #tpu.memory_space<vmem>>, vector<128x128xbf16>
      %cst_22 = arith.constant dense<0.000000e+00> : vector<8x128xf32>
      %29 = tpu.matmul %27, %28, %cst_22 {dimension_numbers = #tpu.dot_dimension_numbers<[1], [0], [0], [1], [0, 0, 1, 1], [], []>} : vector<8x128xbf16>, vector<128x128xbf16>, vector<8x128xf32> -> vector<8x128xf32>
      %c0_23 = arith.constant 0 : index
      %c0_24 = arith.constant 0 : index
      %30 = vector.load %arg8[%c0_23, %c0_24] : memref<1x128xf32, #tpu.memory_space<vmem>>, vector<1x128xf32>
      %31 = vector.broadcast %30 : vector<1x128xf32> to vector<8x128xf32>
      %32 = arith.addf %29, %31 : vector<8x128xf32>
      %cst_25 = arith.constant dense<0xFF800000> : vector<8xf32>
      %33 = vector.multi_reduction <maximumf>, %32, %cst_25 [1] : vector<8x128xf32> to vector<8xf32>
      %34 = vector.shape_cast %33 : vector<8xf32> to vector<8x1xf32>
      %35 = vector.broadcast %34 : vector<8x1xf32> to vector<8x128xf32>
      %36 = arith.subf %32, %35 : vector<8x128xf32>
      %37 = math.exp %36 : vector<8x128xf32>
      %cst_26 = arith.constant dense<0.000000e+00> : vector<8xf32>
      %38 = vector.multi_reduction <add>, %37, %cst_26 [1] : vector<8x128xf32> to vector<8xf32>
      %39 = vector.shape_cast %38 : vector<8xf32> to vector<8x1xf32>
      %40 = math.log %39 : vector<8x1xf32>
      %41 = arith.addf %40, %34 : vector<8x1xf32>
      %42 = vector.broadcast %41 : vector<8x1xf32> to vector<8x128xf32>
      %43 = arith.subf %32, %42 : vector<8x128xf32>
      %c0_27 = arith.constant 0 : index
      %c0_28 = arith.constant 0 : index
      %44 = vector.load %arg9[%c0_27, %c0_28] : memref<8x128xf32, #tpu.memory_space<vmem>>, vector<8x128xf32>
      tpu.vector_store %arg9[%c0_27, %c0_28], %43 {strides = array<i32>} : memref<8x128xf32, #tpu.memory_space<vmem>>, vector<8x128xf32>,
    } else {
    }
    return
  }
  func.func @transform_0(%arg0: i32, %arg1: i32) -> (i32, i32) {
    %c0_i32 = arith.constant 0 : i32
    return %arg0, %arg1 : i32, i32
  }
  func.func @transform_1(%arg0: i32, %arg1: i32) -> (i32, i32) {
    %c0_i32 = arith.constant 0 : i32
    %c0_i32_0 = arith.constant 0 : i32
    return %arg1, %c0_i32 : i32, i32
  }
  func.func @transform_2(%arg0: i32, %arg1: i32) -> (i32, i32) {
    %c0_i32 = arith.constant 0 : i32
    %c0_i32_0 = arith.constant 0 : i32
    %c0_i32_1 = arith.constant 0 : i32
    return %c0_i32, %c0_i32_0 : i32, i32
  }
  func.func @transform_3(%arg0: i32, %arg1: i32) -> (i32, i32) {
    %c0_i32 = arith.constant 0 : i32
    %c0_i32_0 = arith.constant 0 : i32
    %c0_i32_1 = arith.constant 0 : i32
    return %c0_i32, %c0_i32_0 : i32, i32
  }
  func.func @transform_4(%arg0: i32, %arg1: i32) -> (i32, i32) {
    %c0_i32 = arith.constant 0 : i32
    %c0_i32_0 = arith.constant 0 : i32
    %c0_i32_1 = arith.constant 0 : i32
    return %c0_i32, %c0_i32_0 : i32, i32
  }
  func.func @transform_5(%arg0: i32, %arg1: i32) -> (i32, i32) {
    %c0_i32 = arith.constant 0 : i32
    %c0_i32_0 = arith.constant 0 : i32
    %c0_i32_1 = arith.constant 0 : i32
    return %c0_i32, %c0_i32_0 : i32, i32
  }
  func.func @transform_6(%arg0: i32, %arg1: i32) -> (i32, i32) {
    %c0_i32 = arith.constant 0 : i32
    %c0_i32_0 = arith.constant 0 : i32
    %c0_i32_1 = arith.constant 0 : i32
    return %c0_i32, %c0_i32_0 : i32, i32
  }
  func.func @transform_7(%arg0: i32, %arg1: i32) -> (i32, i32) {
    %c0_i32 = arith.constant 0 : i32
    %c0_i32_0 = arith.constant 0 : i32
    return %arg0, %c0_i32 : i32, i32
  }
}

module attributes {stable_mosaic.version = 11 : i64} {
  func.func @mlp_kernel(%arg0: i32, %arg1: i32, %arg2: memref<8x128xf32, #tpu.memory_space<vmem>>, %arg3: memref<128x256xbf16, #tpu.memory_space<vmem>>, %arg4: memref<1x256xf32, #tpu.memory_space<vmem>>, %arg5: memref<256x128xbf16, #tpu.memory_space<vmem>>, %arg6: memref<1x128xf32, #tpu.memory_space<vmem>>, %arg7: memref<128x128xbf16, #tpu.memory_space<vmem>>, %arg8: memref<1x128xf32, #tpu.memory_space<vmem>>, %arg9: memref<8x128xf32, #tpu.memory_space<vmem>>, %arg10: memref<8x256xf32, #tpu.memory_space<vmem>>) attributes {dimension_semantics = [#tpu.dimension_semantics<parallel>, #tpu.dimension_semantics<arbitrary>], iteration_bounds = array<i64: 2, 4>, scalar_prefetch = 0 : i64, scratch_operands = 1 : i64, tpu.core_type = #tpu.core_type<tc>, window_params = [{transform_indices = @transform_0, window_bounds = array<i64: 8, 128>}, {transform_indices = @transform_1, window_bounds = array<i64: 128, 256>}, {pipeline_mode = #tpu.pipeline_mode<synchronous>, transform_indices = @transform_2, window_bounds = array<i64: 1, 256>}, {pipeline_mode = #tpu.pipeline_mode<synchronous>, transform_indices = @transform_3, window_bounds = array<i64: 256, 128>}, {pipeline_mode = #tpu.pipeline_mode<synchronous>, transform_indices = @transform_4, window_bounds = array<i64: 1, 128>}, {pipeline_mode = #tpu.pipeline_mode<synchronous>, transform_indices = @transform_5, window_bounds = array<i64: 128, 128>}, {pipeline_mode = #tpu.pipeline_mode<synchronous>, transform_indices = @transform_6, window_bounds = array<i64: 1, 128>}, {transform_indices = @transform_7, window_bounds = array<i64: 8, 128>}]} {
    %c0_i32 = arith.constant 0 : i32
    %0 = arith.cmpi eq, %arg1, %c0_i32 : i32
    %1 = arith.extui %0 : i1 to i32
    %c0_i32_0 = arith.constant 0 : i32
    %2 = arith.cmpi ne, %1, %c0_i32_0 : i32
    scf.if %2 {
      %cst_9 = arith.constant 0.000000e+00 : f32
      %13 = vector.broadcast %cst_9 : f32 to vector<8x256xf32>
      %c0_10 = arith.constant 0 : index
      %c0_11 = arith.constant 0 : index
      %14 = vector.load %arg10[%c0_10, %c0_11] : memref<8x256xf32, #tpu.memory_space<vmem>>, vector<8x256xf32>
      tpu.vector_store %arg10[%c0_10, %c0_11], %13 {strides = array<i32>} : memref<8x256xf32, #tpu.memory_space<vmem>>, vector<8x256xf32>,
    } else {
    }
    %c0 = arith.constant 0 : index
    %c0_1 = arith.constant 0 : index
    %3 = vector.load %arg10[%c0, %c0_1] : memref<8x256xf32, #tpu.memory_space<vmem>>, vector<8x256xf32>
    %c0_2 = arith.constant 0 : index
    %c0_3 = arith.constant 0 : index
    %4 = vector.load %arg2[%c0_2, %c0_3] : memref<8x128xf32, #tpu.memory_space<vmem>>, vector<8x128xf32>
    %5 = arith.truncf %4 : vector<8x128xf32> to vector<8x128xbf16>
    %c0_4 = arith.constant 0 : index
    %c0_5 = arith.constant 0 : index
    %6 = vector.load %arg3[%c0_4, %c0_5] : memref<128x256xbf16, #tpu.memory_space<vmem>>, vector<128x256xbf16>
    %cst = arith.constant dense<0.000000e+00> : vector<8x256xf32>
    %7 = tpu.matmul %5, %6, %cst {dimension_numbers = #tpu.dot_dimension_numbers<[1], [0], [0], [1], [0, 0, 1, 1], [], []>} : vector<8x128xbf16>, vector<128x256xbf16>, vector<8x256xf32> -> vector<8x256xf32>
    %8 = arith.addf %3, %7 : vector<8x256xf32>
    %c0_6 = arith.constant 0 : index
    %c0_7 = arith.constant 0 : index
    %9 = vector.load %arg10[%c0_6, %c0_7] : memref<8x256xf32, #tpu.memory_space<vmem>>, vector<8x256xf32>
    tpu.vector_store %arg10[%c0_6, %c0_7], %8 {strides = array<i32>} : memref<8x256xf32, #tpu.memory_space<vmem>>, vector<8x256xf32>,
    %c3_i32 = arith.constant 3 : i32
    %10 = arith.cmpi eq, %arg1, %c3_i32 : i32
    %11 = arith.extui %10 : i1 to i32
    %c0_i32_8 = arith.constant 0 : i32
    %12 = arith.cmpi ne, %11, %c0_i32_8 : i32
    scf.if %12 {
      %c0_9 = arith.constant 0 : index
      %c0_10 = arith.constant 0 : index
      %13 = vector.load %arg10[%c0_9, %c0_10] : memref<8x256xf32, #tpu.memory_space<vmem>>, vector<8x256xf32>
      %c0_11 = arith.constant 0 : index
      %c0_12 = arith.constant 0 : index
      %14 = vector.load %arg4[%c0_11, %c0_12] : memref<1x256xf32, #tpu.memory_space<vmem>>, vector<1x256xf32>
      %15 = vector.broadcast %14 : vector<1x256xf32> to vector<8x256xf32>
      %16 = arith.addf %13, %15 : vector<8x256xf32>
      %cst_13 = arith.constant 0.000000e+00 : f32
      %17 = vector.broadcast %cst_13 : f32 to vector<8x256xf32>
      %18 = arith.maximumf %16, %17 : vector<8x256xf32>
      %19 = arith.truncf %18 : vector<8x256xf32> to vector<8x256xbf16>
      %c0_14 = arith.constant 0 : index
      %c0_15 = arith.constant 0 : index
      %20 = vector.load %arg5[%c0_14, %c0_15] : memref<256x128xbf16, #tpu.memory_space<vmem>>, vector<256x128xbf16>
      %cst_16 = arith.constant dense<0.000000e+00> : vector<8x128xf32>
      %21 = tpu.matmul %19, %20, %cst_16 {dimension_numbers = #tpu.dot_dimension_numbers<[1], [0], [0], [1], [0, 0, 1, 1], [], []>} : vector<8x256xbf16>, vector<256x128xbf16>, vector<8x128xf32> -> vector<8x128xf32>
      %c0_17 = arith.constant 0 : index
      %c0_18 = arith.constant 0 : index
      %22 = vector.load %arg6[%c0_17, %c0_18] : memref<1x128xf32, #tpu.memory_space<vmem>>, vector<1x128xf32>
      %23 = vector.broadcast %22 : vector<1x128xf32> to vector<8x128xf32>
      %24 = arith.addf %21, %23 : vector<8x128xf32>
      %cst_19 = arith.constant 0.000000e+00 : f32
      %25 = vector.broadcast %cst_19 : f32 to vector<8x128xf32>
      %26 = arith.maximumf %24, %25 : vector<8x128xf32>
      %27 = arith.truncf %26 : vector<8x128xf32> to vector<8x128xbf16>
      %c0_20 = arith.constant 0 : index
      %c0_21 = arith.constant 0 : index
      %28 = vector.load %arg7[%c0_20, %c0_21] : memref<128x128xbf16, #tpu.memory_space<vmem>>, vector<128x128xbf16>
      %cst_22 = arith.constant dense<0.000000e+00> : vector<8x128xf32>
      %29 = tpu.matmul %27, %28, %cst_22 {dimension_numbers = #tpu.dot_dimension_numbers<[1], [0], [0], [1], [0, 0, 1, 1], [], []>} : vector<8x128xbf16>, vector<128x128xbf16>, vector<8x128xf32> -> vector<8x128xf32>
      %c0_23 = arith.constant 0 : index
      %c0_24 = arith.constant 0 : index
      %30 = vector.load %arg8[%c0_23, %c0_24] : memref<1x128xf32, #tpu.memory_space<vmem>>, vector<1x128xf32>
      %31 = vector.broadcast %30 : vector<1x128xf32> to vector<8x128xf32>
      %32 = arith.addf %29, %31 : vector<8x128xf32>
      %cst_25 = arith.constant dense<0xFF800000> : vector<8xf32>
      %33 = vector.multi_reduction <maximumf>, %32, %cst_25 [1] : vector<8x128xf32> to vector<8xf32>
      %34 = vector.shape_cast %33 : vector<8xf32> to vector<8x1xf32>
      %35 = vector.broadcast %34 : vector<8x1xf32> to vector<8x128xf32>
      %36 = arith.subf %32, %35 : vector<8x128xf32>
      %37 = math.exp %36 : vector<8x128xf32>
      %cst_26 = arith.constant dense<0.000000e+00> : vector<8xf32>
      %38 = vector.multi_reduction <add>, %37, %cst_26 [1] : vector<8x128xf32> to vector<8xf32>
      %39 = vector.shape_cast %38 : vector<8xf32> to vector<8x1xf32>
      %40 = math.log %39 : vector<8x1xf32>
      %41 = arith.addf %40, %34 : vector<8x1xf32>
      %42 = vector.broadcast %41 : vector<8x1xf32> to vector<8x128xf32>
      %43 = arith.subf %32, %42 : vector<8x128xf32>
      %c0_27 = arith.constant 0 : index
      %c0_28 = arith.constant 0 : index
      %44 = vector.load %arg9[%c0_27, %c0_28] : memref<8x128xf32, #tpu.memory_space<vmem>>, vector<8x128xf32>
      tpu.vector_store %arg9[%c0_27, %c0_28], %43 {strides = array<i32>} : memref<8x128xf32, #tpu.memory_space<vmem>>, vector<8x128xf32>,
    } else {
    }
    return
  }
  func.func @transform_0(%arg0: i32, %arg1: i32) -> (i32, i32) {
    %c0_i32 = arith.constant 0 : i32
    return %arg0, %arg1 : i32, i32
  }
  func.func @transform_1(%arg0: i32, %arg1: i32) -> (i32, i32) {
    %c0_i32 = arith.constant 0 : i32
    %c0_i32_0 = arith.constant 0 : i32
    return %arg1, %c0_i32 : i32, i32
  }
  func.func @transform_2(%arg0: i32, %arg1: i32) -> (i32, i32) {
    %c0_i32 = arith.constant 0 : i32
    %c0_i32_0 = arith.constant 0 : i32
    %c0_i32_1 = arith.constant 0 : i32
    return %c0_i32, %c0_i32_0 : i32, i32
  }
  func.func @transform_3(%arg0: i32, %arg1: i32) -> (i32, i32) {
    %c0_i32 = arith.constant 0 : i32
    %c0_i32_0 = arith.constant 0 : i32
    %c0_i32_1 = arith.constant 0 : i32
    return %c0_i32, %c0_i32_0 : i32, i32
  }
  func.func @transform_4(%arg0: i32, %arg1: i32) -> (i32, i32) {
    %c0_i32 = arith.constant 0 : i32
    %c0_i32_0 = arith.constant 0 : i32
    %c0_i32_1 = arith.constant 0 : i32
    return %c0_i32, %c0_i32_0 : i32, i32
  }
  func.func @transform_5(%arg0: i32, %arg1: i32) -> (i32, i32) {
    %c0_i32 = arith.constant 0 : i32
    %c0_i32_0 = arith.constant 0 : i32
    %c0_i32_1 = arith.constant 0 : i32
    return %c0_i32, %c0_i32_0 : i32, i32
  }
  func.func @transform_6(%arg0: i32, %arg1: i32) -> (i32, i32) {
    %c0_i32 = arith.constant 0 : i32
    %c0_i32_0 = arith.constant 0 : i32
    %c0_i32_1 = arith.constant 0 : i32
    return %c0_i32, %c0_i32_0 : i32, i32
  }
  func.func @transform_7(%arg0: i32, %arg1: i32) -> (i32, i32) {
    %c0_i32 = arith.constant 0 : i32
    %c0_i32_0 = arith.constant 0 : i32
    return %arg0, %c0_i32 : i32, i32
  }
}

</mosaic_0001>

<bundles_post_ra>
// kernel: tpu_custom_call.1
= control target key start
LH: loop header
LB: loop body
LE: loop exit
PB: predicated region body
PF: predicated region fallthrough
CT: control target
= control target key end

     0   :  { %s2102_s0 = inlined_call_operand.hbm [shape: f32[16,512], index: 0, kind: input, shape index: {}]   ;;  %s2103_s1 = inlined_call_operand.hbm [shape: bf16[512,256], index: 1, kind: input, shape index: {}]   ;;  %s2104_s2 = inlined_call_operand.vmem [shape: f32[1,256], index: 2, kind: input, shape index: {}]   ;;  %s2105_s3 = inlined_call_operand.hbm [shape: bf16[256,128], index: 3, kind: input, shape index: {}]   ;;  %s2106_s4 = inlined_call_operand.vmem [shape: f32[1,128], index: 4, kind: input, shape index: {}]   ;;  %s2107_s5 = inlined_call_operand.hbm [shape: bf16[128,128], index: 5, kind: input, shape index: {}]   ;;  %s2108_s6 = inlined_call_operand.vmem [shape: f32[1,128], index: 6, kind: input, shape index: {}]   ;;  %s2109_s7 = inlined_call_operand.hbm [shape: f32[16,128], index: 7, kind: output, shape index: {}]  }
   0x1   :  { %2124 = sst [smem:[#allocation25_spill]] %s2104_s2 }
   0x2   :  { %2125 = sst [smem:[#allocation26_spill]] %s2105_s3 }
   0x3   :  { %2126 = sst [smem:[#allocation27_spill]] %s2106_s4 }
   0x4   :  { %2127 = sst [smem:[#allocation28_spill]] %s2107_s5 }
   0x5   :  { %2128 = sst [smem:[#allocation29_spill]] %s2108_s6 }
   0x6   :  { %2129 = sst [smem:[#allocation30_spill]] %s2109_s7 }
   0x7   :  { %12 = vsyncpa [#allocation4], 0 }
   0x8   :  { %14 = vsyncpa [#allocation4 + $0x1], 0 }
   0x9   :  { %15 = vsyncpa [#allocation7], 0 }
   0xa   :  { %17 = vsyncpa [#allocation7 + $0x1], 0 }
   0xb   :  { %18 = vsyncpa [#allocation10], 0 }
   0xc   :  { %19 = vsyncpa [#allocation5], 0 }
   0xd   :  { %21 = vsyncpa [#allocation5 + $0x1], 0  ;;  %s1657_s24 = smov 0   ;;  %s1659_s25 = smov 0  }
   0xe   :  { %s1661_s26 = smov 0   ;;  %s1663_s27 = smov 0  }
   0xf   :  { %s1665_s28 = smov 0   ;;  %s1667_s29 = smov 0  }
  0x10   :  { %s1669_s30 = smov 0   ;;  %s1671_s8 = smov 0  }
  0x11   :  { %s1673_s9 = smov 0   ;;  %s1675_s10 = smov 0  }
  0x12   :  { %s1677_s11 = smov 0   ;;  %s1679_s12 = smov 0  }
  0x13   :  { %s1681_s13 = smov 0   ;;  %s1683_s14 = smov 0  }
  0x14 LB: > { %2130 = sst [smem:[#allocation17_spill]] %s1550_s24  ;;  %s1726_s15 = sadd.s32 4294967295, %s1602_s14   ;;  %s1602_s14 = sphi %s1683_s14, %s27_s14   ;;  %s1598_s13 = sphi %s1681_s13, %s2188_s13   ;;  %s1594_s12 = sphi %s1679_s12, %s2187_s12   ;;  %s1590_s11 = sphi %s1677_s11, %s2186_s11   ;;  %s1586_s10 = sphi %s1675_s10, %s2185_s10   ;;  %s1582_s9 = sphi %s1673_s9, %s2184_s9   ;;  %s1578_s8 = sphi %s1671_s8, %s2183_s8   ;;  %s1574_s30 = sphi %s1669_s30, %s2182_s30   ;;  %s1570_s29 = sphi %s1667_s29, %s2181_s29   ;;  %s1566_s28 = sphi %s1665_s28, %s2180_s28   ;;  %s1562_s27 = sphi %s1663_s27, %s2179_s27   ;;  %s1558_s26 = sphi %s1661_s26, %s2178_s26   ;;  %s1554_s25 = sphi %s1659_s25, %s2177_s25   ;;  %s1550_s24 = sphi %s1657_s24, %s2173_s24  }
  0x15   : > { %2131 = sst [smem:[#allocation18_spill]] %s1554_s25  ;;  %s997_s16 = sadd.s32 4294967294, %s1602_s14  }
  0x16   : > { %2132 = sst [smem:[#allocation19_spill]] %s1586_s10  ;;  %p2115_p0 = scmp.eq.s32.totalorder %s1726_s15, 0 }
  0x17   : > { %2133 = sst [smem:[#allocation20_spill]] %s1590_s11  ;;  %p87_p1 = scmp.ne.s32.totalorder %s1566_s28, %s1562_s27 }
  0x18   : > { %p215_p2 = scmp.ne.s32.totalorder %s1558_s26, %s1554_s25  ;;  %p216_p3 = scmp.eq.s32.totalorder %s1726_s15, 7 }
  0x19   : > { %p1736_p4 = por %p87_p1, %p2115_p0  ;;  %p221_p5 = scmp.ne.s32.totalorder %s1554_s25, %s1550_s24 }
  0x1a   : > { %p1742_p6 = por %p216_p3, %p215_p2  ;;  %p222_p7 = scmp.eq.s32.totalorder %s997_s16, 7 }
  0x1b   : > { %s2134_s17 = scalar_select %p1736_p4, 1, 0 }
  0x1c   : > { %s2135_s18 = scalar_select %p1742_p6, 1, 0 }
  0x1d   : > { %p998_p8 = scmp.ge.s32.totalorder %s1602_s14, 1  ;;  %p229_p9 = scmp.lt.s32.totalorder %s1602_s14, 9 }
  0x1e   : > { %2136 = sst [smem:[#allocation21_spill]] %s2135_s18  ;;  %p1748_p10 = por %p222_p7, %p221_p5 }
  0x1f   : > { %p1752_p11 = pnand %p998_p8, %p229_p9  ;;  %s1604_s21 = smov [#allocation8]  }
  0x20   : > { %s2137_s19 = scalar_select %p1748_p10, 1, 0 }
  0x21   : > { %s2139_s20 = scalar_select %p1752_p11, 1, 0 }
  0x22   : > { %2138 = sst [smem:[#allocation22_spill]] %s2137_s19  ;;  %s244_s22 = sshll.u32 %s1604_s21, 4  ;;  %s245_s22 = int_to_ptr.vmem [resolvable:$true] %s244_s22 }
  0x23   : > { %p1130_p12 = pneg %p1752_p11  ;;  %s1605_s27 = smov [#allocation9]  }
  0x24   : > { %s260_s16 = sshll.u32 %s1605_s27, 4  ;;  %s2141_s3 = sld [smem:[#allocation26_spill]]  ;;  %s1764_s16 = int_to_ptr.vmem [resolvable:$true] %s260_s16 }
  0x25   : > { %p1760_p13 = pnand %p1130_p12, %p2115_p0 }
  0x27   : > { %p1330_p2 = pneg %p1760_p13 }
  0x2a   : > { %s1328_s7 = scalar_lea.hbm %s2141_s3, 2048 }
  0x2b   : > { %p1329_p1 = scmp.ne.s32.totalorder %s2141_s3, %s1328_s7  ;;  %p1335_p7 = scmp.lt.u32.totalorder %s1328_s7, %s2141_s3 }
  0x2d   : > { %p1331_p3 = pnand %p1330_p2, %p1329_p1 }
  0x2f   : > { %p1332_p5 = pneg %p1331_p3 }
  0x31   : > { %p1337_p8 = pnand %p1335_p7, %p1332_p5 }
  0x33   : > { %1340 = shalt.err (!%p1337_p8)
}
  0x34   : > { %s1341_s27 = scalar_lea.vmem %s245_s22, 2048  ;;  %p1349_p10 = scmp.lt.s32.totalorder %s245_s22, %s245_s22 }
  0x35   : > { %p1342_p9 = scmp.ne.s32.totalorder %s245_s22, %s1341_s27  ;;  %p1350_p6 = scmp.lt.s32.totalorder %s1341_s27, %s1341_s27 }
  0x37   : > { %p1344_p12 = pnand %p1342_p9, %p1330_p2  ;;  %p1351_p4 = por %p1350_p6, %p1349_p10 }
  0x39   : > { %p1345_p0 = pneg %p1344_p12 }
  0x3b   : > { %p1352_p11 = pnand %p1351_p4, %p1345_p0 }
  0x3d   : > { %1355 = shalt.err (!%p1352_p11)
}
  0x3e   : > { %s1606_s24 = smov 64   ;;  %s1607_s18 = smov 4  }
  0x3f   : > { %1133 = dma.hbm_to_vmem [thread:$0]  (!%p1760_p13), %s2141_s3, 2048, %s245_s22, [#allocation7], %s1606_s24, %s1606_s24, %s1607_s18  }
  0x40   : > { %s2142_s5 = sld [smem:[#allocation28_spill]] }
  0x46   : > { %s1356_s21 = scalar_lea.hbm %s2142_s5, 1024 }
  0x47   : > { %p1357_p1 = scmp.ne.s32.totalorder %s2142_s5, %s1356_s21  ;;  %p1363_p6 = scmp.lt.u32.totalorder %s1356_s21, %s2142_s5 }
  0x49   : > { %p1359_p0 = pnand %p1357_p1, %p1330_p2 }
  0x4b   : > { %p1360_p4 = pneg %p1359_p0 }
  0x4d   : > { %p1365_p10 = pnand %p1363_p6, %p1360_p4 }
  0x4f   : > { %1368 = shalt.err (!%p1365_p10)
}
  0x50   : > { %s1369_s22 = scalar_lea.vmem %s1764_s16, 1024  ;;  %p1377_p7 = scmp.lt.s32.totalorder %s1764_s16, %s1764_s16 }
  0x51   : > { %p1370_p11 = scmp.ne.s32.totalorder %s1764_s16, %s1369_s22  ;;  %p1378_p8 = scmp.lt.s32.totalorder %s1369_s22, %s1369_s22 }
  0x53   : > { %p1372_p3 = pnand %p1370_p11, %p1330_p2  ;;  %p1379_p9 = por %p1378_p8, %p1377_p7 }
  0x55   : > { %p1373_p5 = pneg %p1372_p3 }
  0x57   : > { %p1380_p12 = pnand %p1379_p9, %p1373_p5 }
  0x59   : > { %1383 = shalt.err (!%p1380_p12)
}
  0x5a   : > { %1136 = dma.hbm_to_vmem [thread:$0]  (!%p1760_p13), %s2142_s5, 1024, %s1764_s16, [#allocation10], %s1606_s24, %s1606_s24, %s1607_s18  }
  0x5b   : > { %s36_s10 = sadd.s32 1, %s1594_s12  ;;  %s39_s23 = sadd.s32 1, %s1598_s13 }
  0x5c   : > { %p37_p2 = scmp.ge.s32.totalorder %s36_s10, 4  ;;  %s48_s6 = sadd.s32 1, %s1582_s9 }
  0x5d   : > { %p55_p1 = scmp.ne.s32.totalorder %s1582_s9, %s1578_s8  ;;  %p56_p0 = scmp.eq.s32.totalorder %s1602_s14, 0 }
  0x5e   : > { %s2190_s10 = smov (%p37_p2, %s36_s10), 0  ;;  %s2192_s23 = smov (!%p37_p2, %s39_s23), %s1598_s13 }
  0x5f   : > { %2143 = sst [smem:[#allocation23_spill]] %s2190_s10  ;;  %s44_s7 = ssub.s32 %s1594_s12, %s2190_s10 }
  0x60   : > { %p41_p13 = scmp.ge.s32.totalorder %s2192_s23, 2  ;;  %p61_p4 = scmp.ne.s32.totalorder %s1578_s8, %s1574_s30 }
  0x61   : > { %p1828_p6 = por %p56_p0, %p55_p1  ;;  %p72_p10 = scmp.eq.s32.totalorder %s44_s7, 0 }
  0x62   : > { %s2194_s23 = smov (%p41_p13, %s2192_s23), 0  ;;  %p2146_p11 = scmp.eq.s32.totalorder %s1726_s15, 0 }
  0x63   : > { %2145 = sst [smem:[#allocation24_spill]] %s2194_s23  ;;  %s74_s18 = sadd.s32 1, %s1570_s29 }
  0x64   : > { %p1836_p3 = por %p2146_p11, %p61_p4  ;;  %s43_s30 = ssub.s32 %s1598_s13, %s2194_s23 }
  0x65   : > { %p81_p5 = scmp.ne.s32.totalorder %s1570_s29, %s1566_s28  ;;  %s45_s11 = sor.u32 %s44_s7, %s43_s30 }
  0x66   : > { %s2147_s24 = scalar_select %p1836_p3, 1, 0 }
  0x67   : > { %p203_p7 = scmp.eq.s32.totalorder %s43_s30, 0  ;;  %p46_p8 = scmp.eq.s32.totalorder %s45_s11, 0 }
  0x68   : > { %p1847_p9 = por %p81_p5, %p56_p0  ;;  %s205_s22 = sadd.s32 1, %s1558_s26 }
  0x69   : > { %s1852_s21 = scalar_select %p72_p10, %s1570_s29, %s74_s18  }
  0x6a   : > { %s1855_s27 = scalar_select %p46_p8, %s1582_s9, %s48_s6  }
  0x6b   : > { %p1150_p12 = scmp.lt.s32.totalorder %s1602_s14, 8  ;;  %s277_s4 = sand.u32 1, %s1582_s9  }
  0x6c   : > { %s1860_s2 = scalar_select %p203_p7, %s1558_s26, %s205_s22  }
  0x6d   : > { %s1003_s7 = sshll.u32 %s1598_s13, 2  ;;  %s1002_s30 = sshll.u32 %s277_s4, 3 }
  0x6e   : > { %s286_s11 = sadd.s32 %s1594_s12, %s1003_s7  ;;  %s281_s5 = scalar_lea.vmem [#allocation3], %s1002_s30 }
  0x6f   : > { %s1004_s3 = sshll.u32 %s286_s11, 7  ;;  %s290_s23 = sshll.u32 %s281_s5, 4  ;;  %s1870_s23 = int_to_ptr.vmem [resolvable:$true] %s290_s23 }
  0x70   : > { %s1868_s18 = scalar_lea.hbm %s2102_s0, %s1004_s3  ;;  %p1874_p2 = pnand %p1150_p12, %p1828_p6 }
  0x71   : > { %p1880_p1 = pnand %p1150_p12, %p1847_p9  ;;  %s297_s3 = sand.u32 1, %s1602_s14  }
  0x72   : > { %s299_s25 = sand.u32 1, %s1570_s29   ;;  %s278_s10 = scalar_lea.sflag [#allocation4], %s277_s4 }
  0x73   : > { %s1384_s22 = scalar_lea.hbm %s1868_s18, 128  ;;  %p1386_p13 = pneg %p1874_p2 }
  0x74   : > { %p1385_p0 = scmp.ne.s32.totalorder %s1868_s18, %s1384_s22  ;;  %s1389_s19 = scalar_lea.hbm %s2102_s0, 1024 }
  0x75   : > { %p1390_p10 = scmp.lt.u32.totalorder %s1868_s18, %s2102_s0  ;;  %p1391_p11 = scmp.lt.u32.totalorder %s1389_s19, %s1384_s22 }
  0x76   : > { %p1387_p4 = pnand %p1386_p13, %p1385_p0  ;;  %p1393_p7 = scmp.lt.u32.totalorder %s1384_s22, %s1868_s18 }
  0x77   : > { %p1392_p5 = por %p1391_p11, %p1390_p10 }
  0x78   : > { %p1388_p6 = pneg %p1387_p4 }
  0x79   : > { %p1394_p8 = por %p1393_p7, %p1392_p5 }
  0x7b   : > { %p1395_p9 = pnand %p1394_p8, %p1388_p6 }
  0x7d   : > { %1398 = shalt.err (!%p1395_p9)
}
  0x7e   : > { %s1399_s4 = scalar_lea.vmem %s1870_s23, 128  ;;  %s1608_s16 = smov [#allocation3]  }
  0x7f   : > { %p1400_p12 = scmp.ne.s32.totalorder %s1870_s23, %s1399_s4  ;;  %s1404_s7 = sshll.u32 %s1608_s16, 4  ;;  %s1405_s7 = int_to_ptr.vmem [resolvable:$false] %s1404_s7 }
  0x80   : > { %s1406_s30 = scalar_lea.vmem %s1405_s7, 256  ;;  %p1407_p3 = scmp.lt.s32.totalorder %s1870_s23, %s1405_s7 }
  0x81   : > { %p1402_p0 = pnand %p1400_p12, %p1386_p13  ;;  %p1408_p10 = scmp.lt.s32.totalorder %s1406_s30, %s1399_s4 }
  0x83   : > { %p1403_p4 = pneg %p1402_p0  ;;  %p1409_p11 = por %p1408_p10, %p1407_p3 }
  0x85   : > { %p1410_p5 = pnand %p1409_p11, %p1403_p4 }
  0x87   : > { %1413 = shalt.err (!%p1410_p5)
}
  0x88   : > { %1140 = dma.hbm_to_vmem [thread:$0]  (!%p1874_p2), %s1868_s18, 128, %s1870_s23, %s278_s10  }
  0x89   : > { %s1005_s22 = sshll.u32 %s299_s25, 7  ;;  %s1064_s19 = sshll.u32 %s1594_s12, 11 }
  0x8a   : > { %s1917_s4 = scalar_lea.hbm %s2103_s1, %s1064_s19  ;;  %s301_s6 = scalar_lea.vmem [#allocation6], %s1005_s22 }
  0x8b   : > { %s309_s7 = sshll.u32 %s301_s6, 4  ;;  %s1923_s30 = scalar_lea.sflag [#allocation7], %s297_s3  ;;  %s1919_s7 = int_to_ptr.vmem [resolvable:$true] %s309_s7 }
  0x8c   : > { %s1414_s23 = scalar_lea.hbm %s1917_s4, 2048  ;;  %p1416_p2 = pneg %p1880_p1 }
  0x8d   : > { %p1415_p3 = scmp.ne.s32.totalorder %s1917_s4, %s1414_s23  ;;  %s1419_s10 = scalar_lea.hbm %s2103_s1, 8192 }
  0x8e   : > { %p1420_p7 = scmp.lt.u32.totalorder %s1917_s4, %s2103_s1  ;;  %p1421_p8 = scmp.lt.u32.totalorder %s1419_s10, %s1414_s23 }
  0x8f   : > { %p1417_p13 = pnand %p1416_p2, %p1415_p3  ;;  %p1423_p12 = scmp.lt.u32.totalorder %s1414_s23, %s1917_s4 }
  0x90   : > { %p1422_p9 = por %p1421_p8, %p1420_p7 }
  0x91   : > { %p1418_p6 = pneg %p1417_p13 }
  0x92   : > { %p1424_p0 = por %p1423_p12, %p1422_p9 }
  0x94   : > { %p1425_p4 = pnand %p1424_p0, %p1418_p6 }
  0x96   : > { %1428 = shalt.err (!%p1425_p4)
}
  0x97   : > { %s1429_s3 = scalar_lea.vmem %s1919_s7, 2048  ;;  %s1609_s11 = smov [#allocation6]  }
  0x98   : > { %p1430_p10 = scmp.ne.s32.totalorder %s1919_s7, %s1429_s3  ;;  %s1434_s16 = sshll.u32 %s1609_s11, 4  ;;  %s1435_s16 = int_to_ptr.vmem [resolvable:$false] %s1434_s16 }
  0x99   : > { %s1436_s6 = scalar_lea.vmem %s1435_s16, 4096  ;;  %p1437_p3 = scmp.lt.s32.totalorder %s1919_s7, %s1435_s16 }
  0x9a   : > { %p1432_p11 = pnand %p1430_p10, %p1416_p2  ;;  %p1438_p13 = scmp.lt.s32.totalorder %s1436_s6, %s1429_s3 }
  0x9c   : > { %p1433_p5 = pneg %p1432_p11  ;;  %p1439_p7 = por %p1438_p13, %p1437_p3 }
  0x9e   : > { %p1440_p8 = pnand %p1439_p7, %p1433_p5 }
  0xa0   : > { %1443 = shalt.err (!%p1440_p8)
}
  0xa1   : > { %s1610_s23 = smov 128   ;;  %s1611_s18 = smov 8  }
  0xa2   : > { %1143 = dma.hbm_to_vmem [thread:$0]  (!%p1880_p1), %s1917_s4, 2048, %s1919_s7, %s1923_s30, %s1610_s23, %s1610_s23, %s1611_s18  }
  0xa3   : > { %p2151_p2 = scmp.ne.s32.totalorder %s2139_s20, 0 }
  0xa4   : > { %s323_s25 = sand.u32 (!%p2151_p2), 1, %s1578_s8   ;;  %p2152_p6 = scmp.ne.s32.totalorder (!%p2151_p2), %s2147_s24, 0 }
  0xa5   : > { %321 = sbr.rel (%p2151_p2) target bundleno = 1241 (0x4d9), region = 48  ;;  %s1954_s10 = sshll.u32 (!%p2151_p2), %s323_s25, 3 }
  0xa6   : > { %s324_s19 = scalar_lea.sflag (!%p2151_p2), [#allocation4], %s323_s25  ;;  %s327_s22 = scalar_lea.vmem (!%p2151_p2), [#allocation3], %s1954_s10 }
  0xac   : > { %1529 = dma.done.wait (%p2152_p6), %s324_s19, 128  }
  0xad   : > { %1531 = vsyncadd (%p2152_p6), %s324_s19, 4294967168  ;;  %s332_s5 = sand.u32 1, %s1726_s15   ;;  %s334_s4 = sand.u32 1, %s1566_s28  }
  0xae   : > { %s1011_s20 = sshll.u32 %s334_s4, 7  ;;  %s333_s7 = scalar_lea.sflag [#allocation7], %s332_s5 }
  0xaf   : > { %s1963_s30 = scalar_lea.vmem [#allocation6], %s1011_s20  ;;  %p2153_p1 = scmp.ne.s32.totalorder %s2134_s17, 0 }
  0xb1   : > { %1533 = dma.done.wait (%p2153_p1), %s333_s7, 2048  }
  0xb2   : > { %1535 = vsyncadd (%p2153_p1), %s333_s7, 4294965248  ;;  %p2154_p9 = scmp.eq.s32.totalorder %s1726_s15, 0 }
  0xb4   : > { %1537 = dma.done.wait (%p2154_p9), [#allocation7], 2048   ;;  %p2155_p12 = pmov %p2154_p9 }
  0xb5   : > { %p2156_p0 = pmov %p2154_p9 }
  0xb6   : > { %1539 = vsyncadd (%p2155_p12), [#allocation7], 4294965248 }
  0xb7   : > { %1541 = dma.done.wait (%p2156_p0), [#allocation10], 1024   ;;  %p2157_p4 = pmov %p2156_p0 }
  0xb8   : > { %s2158_s24 = sld [smem:[#allocation18_spill]]  ;;  %s2159_s16 = sld [smem:[#allocation19_spill]] }
  0xb9   : > { %1543 = vsyncadd (%p2157_p4), [#allocation10], 4294966272 }
  0xbe   : > { %s377_s3 = sand.u32 1, %s2158_s24   ;;  %p1015_p10 = scmp.ne.s32.totalorder %s2159_s16, 0 }
  0xbf   : > { %s1980_s11 = sshll.u32 %s377_s3, 3  ;;  %v1612_v0 = vmov (!%p1015_p10), 0.0  }
  0xc0   : > { %s379_s17 = scalar_lea.vmem [#allocation11], %s1980_s11  ;;  %385 = sbr.rel (%p1015_p10) target bundleno = 199 (0xc7), region = 68  ;;  %386 = vst [vmem:[#allocation2] sm:$0xff] (!%p1015_p10), %v1612_v0  ;;  %387 = vst [vmem:[#allocation2 + $0x8] sm:$0xff] (!%p1015_p10), %v1612_v0 }
  0xc7 PF: > { %v1276_v1 = vld [vmem:[%s1963_s30 + $0x4] ss:$8 sps:$4 sm:$0xff]   ;;  %v1278_v2 = vld [vmem:[%s1963_s30] ss:$8 sps:$4 sm:$0xff]   ;;  %v1613_v3 = vmov 0   ;;  %v390_v18 = vld [vmem:[%s327_s22] sm:$0xff] }
  0xc8   : > { %520 = vmatprep.mubr.bf16.mxu0 %v1613_v3  ;;  %488 = vmatprep.subr.bf16.mxu0 %v1276_v1  ;;  %v1279_v4 = vld [vmem:[%s1963_s30 + $0x14] ss:$8 sps:$4 sm:$0xff]   ;;  %v1281_v5 = vld [vmem:[%s1963_s30 + $0x10] ss:$8 sps:$4 sm:$0xff]   ;;  %v1282_v6 = vld [vmem:[%s1963_s30 + $0x24] ss:$8 sps:$4 sm:$0xff]   ;;  %v391_v19 = vpack.c.bf16 %v390_v18, %v390_v18 }
  0xc9   : > { %489 = vmatpush1.bf16.msra.mxu0 %v1278_v2  ;;  %v1284_v7 = vld [vmem:[%s1963_s30 + $0x20] ss:$8 sps:$4 sm:$0xff]   ;;  %v1285_v8 = vld [vmem:[%s1963_s30 + $0x34] ss:$8 sps:$4 sm:$0xff]   ;;  %v1287_v9 = vld [vmem:[%s1963_s30 + $0x30] ss:$8 sps:$4 sm:$0xff]  }
  0xca   : > { %490 = vmatprep.subr.bf16.mxu0 %v1279_v4  ;;  %v1288_v10 = vld [vmem:[%s1963_s30 + $0x44] ss:$8 sps:$4 sm:$0xff]   ;;  %v1290_v11 = vld [vmem:[%s1963_s30 + $0x40] ss:$8 sps:$4 sm:$0xff]   ;;  %v1291_v12 = vld [vmem:[%s1963_s30 + $0x54] ss:$8 sps:$4 sm:$0xff]  }
  0xcb   : > { %v1293_v13 = vld [vmem:[%s1963_s30 + $0x50] ss:$8 sps:$4 sm:$0xff]   ;;  %v1294_v14 = vld [vmem:[%s1963_s30 + $0x64] ss:$8 sps:$4 sm:$0xff]   ;;  %v1296_v15 = vld [vmem:[%s1963_s30 + $0x60] ss:$8 sps:$4 sm:$0xff]  }
  0xcc   : > { %v1297_v16 = vld [vmem:[%s1963_s30 + $0x74] ss:$8 sps:$4 sm:$0xff]   ;;  %v1299_v17 = vld [vmem:[%s1963_s30 + $0x70] ss:$8 sps:$4 sm:$0xff]   ;;  %v388_v20 = vld [vmem:[#allocation2] sm:$0xff]  ;;  %s2160_s15 = sld [smem:[#allocation19_spill]] }
  0xcd   : > { %491 = vmatpush1.bf16.msra.mxu0 %v1281_v5  ;;  %v389_v21 = vld [vmem:[#allocation2 + $0x8] sm:$0xff] }
  0xce   : > { %492 = vmatprep.subr.bf16.mxu0 %v1282_v6 }
  0xd1   : > { %493 = vmatpush1.bf16.msra.mxu0 %v1284_v7 }
  0xd2   : > { %494 = vmatprep.subr.bf16.mxu0 %v1285_v8  ;;  %p1032_p11 = scmp.ne.s32.totalorder %s2160_s15, 3 }
  0xd3   : > { %v1300_v28 = vld [vmem:[#allocation8 + $0x40] sm:$0xff] (!%p1032_p11)   ;;  %v1614_v30 = vmov (!%p1032_p11), 0.0   ;;  %v1302_v31 = vld [vmem:[#allocation8 + $0x48] sm:$0xff] (!%p1032_p11)   ;;  %v1304_v33 = vld [vmem:[#allocation8 + $0x50] sm:$0xff] (!%p1032_p11)   ;;  %v541_v34 = vlaneseq (!%p1032_p11)  ;;  %s2161_s18 = sld [smem:[#allocation25_spill]] (!%p1032_p11)  ;;  %vm1615_vm0 = vmmov (!%p1032_p11), 0  }
  0xd4   : > { %v1301_v29 = vld [vmem:[#allocation8] sm:$0xff] (!%p1032_p11)   ;;  %1096 = vmatprep.subr.bf16.mxu1 (!%p1032_p11), %v1614_v30  ;;  %v1303_v32 = vld [vmem:[#allocation8 + $0x8] sm:$0xff] (!%p1032_p11)   ;;  %v1305_v35 = vld [vmem:[#allocation8 + $0x10] sm:$0xff] (!%p1032_p11)   ;;  %1112 = vmatprep.mubr.msk.bf16.mxu1 (!%p1032_p11), %vm1615_vm0, %v1614_v30  ;;  %s2162_s19 = sld [smem:[#allocation27_spill]] (!%p1032_p11)  ;;  %s2163_s4 = sld [smem:[#allocation29_spill]] (!%p1032_p11) }
  0xd5   : > { %495 = vmatpush1.bf16.msra.mxu0 %v1287_v9  ;;  %v1306_v36 = vld [vmem:[#allocation8 + $0x58] sm:$0xff] (!%p1032_p11)   ;;  %v542_v37 = vshrl.u32 (!%p1032_p11), %v541_v34, 7  ;;  %v1308_v39 = vld [vmem:[#allocation8 + $0x60] sm:$0xff] (!%p1032_p11)   ;;  %v1310_v43 = vld [vmem:[#allocation8 + $0x68] sm:$0xff] (!%p1032_p11)  }
  0xd6   : > { %496 = vmatprep.subr.bf16.mxu0 %v1288_v10  ;;  %v1307_v38 = vld [vmem:[#allocation8 + $0x18] sm:$0xff] (!%p1032_p11)   ;;  %v1309_v42 = vld [vmem:[#allocation8 + $0x20] sm:$0xff] (!%p1032_p11)   ;;  %v1311_v46 = vld [vmem:[#allocation8 + $0x28] sm:$0xff] (!%p1032_p11)  }
  0xd7   : > { %v547_v40 = vsub.s32 (!%p1032_p11), 1, %v542_v37  ;;  %v543_v41 = vsub.s32 (!%p1032_p11), 0, %v542_v37  ;;  %v1316_v48 = vld [vmem:[#allocation9] sm:$0xff] (!%p1032_p11)   ;;  %v1317_v52 = vld [vmem:[#allocation9 + $0x8] sm:$0xff] (!%p1032_p11)   ;;  %v1312_v53 = vld [vmem:[#allocation8 + $0x70] sm:$0xff] (!%p1032_p11)  }
  0xd8   : > { %1097 = vmatpush3.bf16.msra.mxu1 (!%p1032_p11), %v1316_v48  ;;  %v1313_v55 = vld [vmem:[#allocation8 + $0x30] sm:$0xff] (!%p1032_p11)   ;;  %v1314_v59 = vld [vmem:[#allocation8 + $0x78] sm:$0xff] (!%p1032_p11)   ;;  %v1320_v0 = vld [vmem:[#allocation9 + $0x20] sm:$0xff] (!%p1032_p11)  }
  0xd9   : > { %497 = vmatpush1.bf16.msra.mxu0 %v1290_v11  ;;  %v539_v45 = vld [vmem:[%s2161_s18] sm:$0x3] (!%p1032_p11)  ;;  %1098 = vmatprep.subr.bf16.mxu1 (!%p1032_p11), %v1614_v30  ;;  %v1318_v58 = vld [vmem:[#allocation9 + $0x10] sm:$0xff] (!%p1032_p11)   ;;  %v1315_v61 = vld [vmem:[#allocation8 + $0x38] sm:$0xff] (!%p1032_p11)  }
  0xda   : > { %498 = vmatprep.subr.bf16.mxu0 %v1291_v12  ;;  %v548_v47 = vrot.slane (!%p1032_p11), %v539_v45, %v547_v40  ;;  %v544_v49 = vrot.slane (!%p1032_p11), %v539_v45, %v543_v41  ;;  %v1319_v62 = vld [vmem:[#allocation9 + $0x18] sm:$0xff] (!%p1032_p11)   ;;  %v1321_v1 = vld [vmem:[#allocation9 + $0x28] sm:$0xff] (!%p1032_p11)   ;;  %v1322_v2 = vld [vmem:[#allocation9 + $0x30] sm:$0xff] (!%p1032_p11)  }
  0xdb   : > { %v1323_v3 = vld [vmem:[#allocation9 + $0x38] sm:$0xff] (!%p1032_p11)   ;;  %v1033_v5 = vld [vmem:[%s2162_s19] ss:$0 sm:$0xff] (!%p1032_p11) }
  0xdc   : > { %1099 = vmatpush3.bf16.msra.mxu1 (!%p1032_p11), %v1317_v52 }
  0xdd   : > { %499 = vmatpush1.bf16.msra.mxu0 %v1293_v13  ;;  %1100 = vmatprep.subr.bf16.mxu1 (!%p1032_p11), %v1614_v30  ;;  %v1050_v13 = vld [vmem:[%s2163_s4] ss:$0 sm:$0xff] (!%p1032_p11) }
  0xde   : > { %500 = vmatprep.subr.bf16.mxu0 %v1294_v14 }
  0xe0   : > { %1101 = vmatpush3.bf16.msra.mxu1 (!%p1032_p11), %v1318_v58 }
  0xe1   : > { %501 = vmatpush1.bf16.msra.mxu0 %v1296_v15  ;;  %1102 = vmatprep.subr.bf16.mxu1 (!%p1032_p11), %v1614_v30 }
  0xe2   : > { %502 = vmatprep.subr.bf16.mxu0 %v1297_v16 }
  0xe4   : > { %1103 = vmatpush3.bf16.msra.mxu1 (!%p1032_p11), %v1319_v62 }
  0xe5   : > { %503 = vmatpush1.bf16.msra.mxu0 %v1299_v17  ;;  %1104 = vmatprep.subr.bf16.mxu1 (!%p1032_p11), %v1614_v30 }
  0xe6   : > { %1065 = vmatprep.subr.bf16.mxu0 (!%p1032_p11), %v1300_v28 }
  0xe8   : > { %521 = vmatmul.mubr.bf16.vlgmr.msra.gmra.mrb[0].mxu0 %v391_v19  ;;  %1105 = vmatpush3.bf16.msra.mxu1 (!%p1032_p11), %v1320_v0 }
  0xe9   : > { %1066 = vmatpush3.bf16.msra.mxu0 (!%p1032_p11), %v1301_v29  ;;  %1106 = vmatprep.subr.bf16.mxu1 (!%p1032_p11), %v1614_v30 }
  0xea   : > { %1067 = vmatprep.subr.bf16.mxu0 (!%p1032_p11), %v1302_v31 }
  0xec   : > { %1107 = vmatpush3.bf16.msra.mxu1 (!%p1032_p11), %v1321_v1 }
  0xed   : > { %1068 = vmatpush3.bf16.msra.mxu0 (!%p1032_p11), %v1303_v32  ;;  %1108 = vmatprep.subr.bf16.mxu1 (!%p1032_p11), %v1614_v30 }
  0xee   : > { %1069 = vmatprep.subr.bf16.mxu0 (!%p1032_p11), %v1304_v33 }
  0xf0   : > { %1109 = vmatpush3.bf16.msra.mxu1 (!%p1032_p11), %v1322_v2 }
  0xf1   : > { %1070 = vmatpush3.bf16.msra.mxu0 (!%p1032_p11), %v1305_v35  ;;  %1110 = vmatprep.subr.bf16.mxu1 (!%p1032_p11), %v1614_v30 }
  0xf2   : > { %1071 = vmatprep.subr.bf16.mxu0 (!%p1032_p11), %v1306_v36 }
  0xf4   : > { %1111 = vmatpush3.bf16.msra.mxu1 (!%p1032_p11), %v1323_v3 }
  0xf5   : > { %1072 = vmatpush3.bf16.msra.mxu0 (!%p1032_p11), %v1307_v38 }
  0xf6   : > { %1073 = vmatprep.subr.bf16.mxu0 (!%p1032_p11), %v1308_v39 }
  0xf9   : > { %1074 = vmatpush3.bf16.msra.mxu0 (!%p1032_p11), %v1309_v42 }
  0xfa   : > { %1075 = vmatprep.subr.bf16.mxu0 (!%p1032_p11), %v1310_v43 }
  0xfd   : > { %1076 = vmatpush3.bf16.msra.mxu0 (!%p1032_p11), %v1311_v46 }
  0xfe   : > { %1077 = vmatprep.subr.bf16.mxu0 (!%p1032_p11), %v1312_v53 }
 0x101   : > { %1078 = vmatpush3.bf16.msra.mxu0 (!%p1032_p11), %v1313_v55 }
 0x102   : > { %1079 = vmatprep.subr.bf16.mxu0 (!%p1032_p11), %v1314_v59 }
 0x105   : > { %1080 = vmatpush3.bf16.msra.mxu0 (!%p1032_p11), %v1315_v61 }
 0x1b9   : > { %536 = sbr.rel (%p1032_p11) target bundleno = 1214 (0x4be), region = 72 }
 0x1bb   : > { %v522_v22 = vpop.f32.mrb[0].mxu0 }
 0x1bc   : > { %v529_v23 = vadd.f32 %v522_v22, %v388_v20  ;;  %v524_v24 = vpop.f32.mrb[1].mxu0 }
 0x1bd   : > { %v530_v25 = vadd.f32 %v524_v24, %v389_v21  ;;  %v526_v26 = vpop.f32.mrb[2].mxu0 }
 0x1be   : > { %531 = vst [vmem:[#allocation2] sm:$0xff] %v529_v23  ;;  %v527_v27 = vpop.f32.mrb[3].mxu0 }
 0x1bf   : > { %532 = vst [vmem:[#allocation2 + $0x8] sm:$0xff] %v530_v25 }
 0x1c5   : > { %v537_v50 = vld [vmem:[#allocation2] sm:$0xff] }
 0x1c6   : > { %v538_v44 = vld [vmem:[#allocation2 + $0x8] sm:$0xff]  ;;  %v551_v56 = vadd.f32 %v544_v49, %v537_v50 }
 0x1c7   : > { %v552_v51 = vadd.f32 %v548_v47, %v538_v44 }
 0x1c8   : > { %v553_v60 = vmax.f32 %v551_v56, 0.0 }
 0x1c9   : > { %v554_v54 = vmax.f32 %v552_v51, 0.0 }
 0x1ca   : > { %v555_v63 = vpack.c.bf16 %v553_v60, %v553_v60 }
 0x1cb   : > { %v556_v57 = vpack.c.bf16 %v554_v54, %v554_v54 }
 0x1cd   : > { %724 = vmatprep.mubr.bf16.mxu0 %v556_v57 }
 0x1ce   : > { %725 = vmatmul.mubr.bf16.vlgmr.msra.gmra.mrb[0].mxu0 %v555_v63 }
 0x2a1   : > { %v1081_v4 = vpop.f32.mrb[0].mxu0 }
 0x2a2   : > { %v1082_v6 = vpop.f32.mrb[1].mxu0 }
 0x2a3   : > { %v1083_v7 = vadd.f32 %v1082_v6, %v1081_v4  ;;  %v1084_v8 = vpop.f32.mrb[2].mxu0 }
 0x2a4   : > { %v1085_v9 = vpop.f32.mrb[3].mxu0 }
 0x2a5   : > { %v727_v10 = vadd.f32 %v1083_v7, %v1033_v5 }
 0x2a7   : > { %v732_v11 = vmax.f32 %v727_v10, 0.0 }
 0x2a9   : > { %v733_v12 = vpack.c.bf16 %v732_v11, %v732_v11 }
 0x2ab   : > { %1113 = vmatmul.mubr.bf16.vlgmr.msra.gmra.mrb[0].mxu1 %v733_v12 }
 0x37e   : > { %v839_v14 = vpop.f32.mrb[0].mxu1 }
 0x37f   : > { %v840_v15 = vadd.f32 %v1050_v13, %v839_v14  ;;  %v1114_v16 = vpop.f32.mrb[1].mxu1 }
 0x380   : > { %v842_v17 = vpop.f32.mrb[2].mxu1 }
 0x381   : > { %845 = vmax.xlane.f32.xlu0 %v840_v15  ;;  %v1115_v18 = vpop.f32.mrb[3].mxu1 }
 0x40e   : > { %v846_v19 = vpop.xlane.xlu0 %845 }
 0x40f   : > { %v847_v20 = vsub.f32 %v840_v15, %v846_v19 }
 0x411   : > { %v848_v21 = vmul.f32 1.442695, %v847_v20 }
 0x413   : > { %1324 = vpow2.f32 %v848_v21 }
 0x41d   : > { %v1325_v22 = vpop.eup %1324 }
 0x41e   : > { %850 = vadd.xlane.f32.xlu0 %v1325_v22 }
 0x4ab   : > { %v851_v23 = vpop.xlane.xlu0 %850 }
 0x4ac   : > { %1326 = vlog2.f32 %v851_v23 }
 0x4b6   : > { %v1327_v24 = vpop.eup %1326 }
 0x4b7   : > { %v853_v25 = vmul.f32 0.6931472, %v1327_v24 }
 0x4b9   : > { %v854_v26 = vadd.f32 %v853_v25, %v846_v19 }
 0x4bb   : > { %v855_v27 = vsub.f32 %v840_v15, %v854_v26 }
 0x4bd   : > { %856 = vst [vmem:[%s379_s17] sm:$0xff] %v855_v27 }
 0x4be PF: > { %s2164_s20 = sld [smem:[#allocation20_spill]]  ;;  %s2166_s30 = sld [smem:[#allocation21_spill]] }
 0x4bf   : > { %s2167_s6 = sld [smem:[#allocation30_spill]]  ;;  %s871_s18 = sshll.u32 %s379_s17, 4  ;;  %s872_s18 = int_to_ptr.vmem [resolvable:$true] %s871_s18 }
 0x4c0   : > { %s858_s25 = scalar_lea.sflag [#allocation5], %s377_s3  ;;  %s1444_s10 = scalar_lea.vmem %s872_s18, 128 }
 0x4c1   : > { %p1445_p5 = scmp.ne.s32.totalorder %s872_s18, %s1444_s10  ;;  %s1616_s19 = smov [#allocation11]  }
 0x4c2   : > { %s1448_s22 = sshll.u32 %s1616_s19, 4  ;;  %s1449_s22 = int_to_ptr.vmem [resolvable:$false] %s1448_s22 }
 0x4c3   : > { %s1450_s5 = scalar_lea.vmem %s1449_s22, 256  ;;  %p1451_p8 = scmp.lt.s32.totalorder %s872_s18, %s1449_s22 }
 0x4c4   : > { %s1060_s24 = sshll.u32 %s2164_s20, 7  ;;  %p2168_p3 = scmp.ne.s32.totalorder %s2166_s30, 0 }
 0x4c5   : > { %s2027_s23 = scalar_lea.hbm %s2167_s6, %s1060_s24  ;;  %p1452_p2 = scmp.lt.s32.totalorder %s1450_s5, %s1444_s10 }
 0x4c6   : > { %p1446_p13 = pnand %p1445_p5, %p2168_p3 }
 0x4c7   : > { %p1453_p6 = por %p1452_p2, %p1451_p8 }
 0x4c8   : > { %p1447_p7 = pneg %p1446_p13 }
 0x4ca   : > { %p1454_p1 = pnand %p1453_p6, %p1447_p7 }
 0x4cc   : > { %1457 = shalt.err (!%p1454_p1)
}
 0x4cd   : > { %s1458_s3 = scalar_lea.hbm %s2027_s23, 128  ;;  %s1462_s4 = scalar_lea.hbm %s2167_s6, 256 }
 0x4ce   : > { %p1459_p9 = scmp.ne.s32.totalorder %s2027_s23, %s1458_s3  ;;  %p1463_p4 = scmp.lt.u32.totalorder %s2027_s23, %s2167_s6 }
 0x4cf   : > { %p1464_p10 = scmp.lt.u32.totalorder %s1462_s4, %s1458_s3  ;;  %p1466_p5 = scmp.lt.u32.totalorder %s1458_s3, %s2027_s23 }
 0x4d0   : > { %p1460_p12 = pnand %p1459_p9, %p2168_p3 }
 0x4d1   : > { %p1465_p11 = por %p1464_p10, %p1463_p4 }
 0x4d2   : > { %p1461_p0 = pneg %p1460_p12 }
 0x4d3   : > { %p1467_p13 = por %p1466_p5, %p1465_p11 }
 0x4d5   : > { %p1468_p7 = pnand %p1467_p13, %p1461_p0 }
 0x4d7   : > { %1471 = shalt.err (!%p1468_p7)
}
 0x4d8   : > { %1128 = dma.vmem_to_hbm [thread:$0]  (%p2168_p3), %s872_s18, 128, %s2027_s23, %s858_s25  }
 0x4d9 PF: > { %s2169_s24 = sld [smem:[#allocation17_spill]]  ;;  %s2170_s16 = sld [smem:[#allocation22_spill]] }
 0x4da   : > { %p1153_p8 = scmp.ge.s32.totalorder %s1602_s14, 2 }
 0x4df   : > { %s883_s15 = sand.u32 1, %s2169_s24   ;;  %p2171_p2 = scmp.ne.s32.totalorder %s2170_s16, 0 }
 0x4e0   : > { %s884_s10 = scalar_lea.sflag [#allocation5], %s883_s15 }
 0x4e1   : > { %p1145_p6 = pnand %p1153_p8, %p2171_p2 }
 0x4e3   : > { %1545 = dma.done.wait (!%p1145_p6), %s884_s10, 128  }
 0x4e4   : > { %1547 = vsyncadd (!%p1145_p6), %s884_s10, 4294967168  ;;  %s27_s14 = sadd.s32 1, %s1602_s14   ;;  %s2173_s24 = sld [smem:[#allocation18_spill]] }
 0x4e5   : > { %p2055_p1 = scmp.ge.s32.totalorder %s27_s14, 10   ;;  %s2174_s23 = smov %s1855_s27 }
 0x4e6   : > { %s2175_s18 = sld [smem:[#allocation23_spill]]  ;;  %s2176_s22 = sld [smem:[#allocation24_spill]] }
 0x4e7   : > { %s2177_s25 = smov %s1558_s26  ;;  %s2178_s26 = smov %s1860_s2 }
 0x4e8   : > { %s2179_s27 = smov %s1566_s28  ;;  %s2180_s28 = smov %s1570_s29 }
 0x4e9   : > { %s2181_s29 = smov %s1852_s21  ;;  %s2182_s30 = smov %s1578_s8 }
 0x4ea   : > { %s2183_s8 = smov %s1582_s9  ;;  %s2184_s9 = smov %s2174_s23 }
 0x4eb   : > { %s2185_s10 = smov %s1594_s12  ;;  %s2186_s11 = smov %s1598_s13 }
 0x4ec   : > { %s2187_s12 = smov %s2175_s18  ;;  %s2188_s13 = smov %s2176_s22 }
 0x4ed   :  { %26 = sbr.rel (!%p2055_p1) target bundleno = 20 (0x14), region = 122 }
 0x4f4   :  { %889 = vsyncpa [#allocation4], 1 }
 0x4f5   :  { %891 = vsyncpa [#allocation4 + $0x1], 1 }
 0x4f6   :  { %892 = vsyncpa [#allocation7], 1 }
 0x4f7   :  { %894 = vsyncpa [#allocation7 + $0x1], 1 }
 0x4f8   :  { %895 = vsyncpa [#allocation10], 1 }
 0x4f9   :  { %896 = vsyncpa [#allocation5], 1 }
 0x4fa   :  { %898 = vsyncpa [#allocation5 + $0x1], 1 }

// kernel: tpu_custom_call.1
= control target key start
LH: loop header
LB: loop body
LE: loop exit
PB: predicated region body
PF: predicated region fallthrough
CT: control target
= control target key end

     0   :  { %s2102_s0 = inlined_call_operand.hbm [shape: f32[16,512], index: 0, kind: input, shape index: {}]   ;;  %s2103_s1 = inlined_call_operand.hbm [shape: bf16[512,256], index: 1, kind: input, shape index: {}]   ;;  %s2104_s2 = inlined_call_operand.vmem [shape: f32[1,256], index: 2, kind: input, shape index: {}]   ;;  %s2105_s3 = inlined_call_operand.hbm [shape: bf16[256,128], index: 3, kind: input, shape index: {}]   ;;  %s2106_s4 = inlined_call_operand.vmem [shape: f32[1,128], index: 4, kind: input, shape index: {}]   ;;  %s2107_s5 = inlined_call_operand.hbm [shape: bf16[128,128], index: 5, kind: input, shape index: {}]   ;;  %s2108_s6 = inlined_call_operand.vmem [shape: f32[1,128], index: 6, kind: input, shape index: {}]   ;;  %s2109_s7 = inlined_call_operand.hbm [shape: f32[16,128], index: 7, kind: output, shape index: {}]  }
   0x1   :  { %2124 = sst [smem:[#allocation25_spill]] %s2104_s2 }
   0x2   :  { %2125 = sst [smem:[#allocation26_spill]] %s2105_s3 }
   0x3   :  { %2126 = sst [smem:[#allocation27_spill]] %s2106_s4 }
   0x4   :  { %2127 = sst [smem:[#allocation28_spill]] %s2107_s5 }
   0x5   :  { %2128 = sst [smem:[#allocation29_spill]] %s2108_s6 }
   0x6   :  { %2129 = sst [smem:[#allocation30_spill]] %s2109_s7 }
   0x7   :  { %12 = vsyncpa [#allocation4], 0 }
   0x8   :  { %14 = vsyncpa [#allocation4 + $0x1], 0 }
   0x9   :  { %15 = vsyncpa [#allocation7], 0 }
   0xa   :  { %17 = vsyncpa [#allocation7 + $0x1], 0 }
   0xb   :  { %18 = vsyncpa [#allocation10], 0 }
   0xc   :  { %19 = vsyncpa [#allocation5], 0 }
   0xd   :  { %21 = vsyncpa [#allocation5 + $0x1], 0  ;;  %s1657_s24 = smov 0   ;;  %s1659_s25 = smov 0  }
   0xe   :  { %s1661_s26 = smov 0   ;;  %s1663_s27 = smov 0  }
   0xf   :  { %s1665_s28 = smov 0   ;;  %s1667_s29 = smov 0  }
  0x10   :  { %s1669_s30 = smov 0   ;;  %s1671_s8 = smov 0  }
  0x11   :  { %s1673_s9 = smov 0   ;;  %s1675_s10 = smov 0  }
  0x12   :  { %s1677_s11 = smov 0   ;;  %s1679_s12 = smov 0  }
  0x13   :  { %s1681_s13 = smov 0   ;;  %s1683_s14 = smov 0  }
  0x14 LB: > { %2130 = sst [smem:[#allocation17_spill]] %s1550_s24  ;;  %s1726_s15 = sadd.s32 4294967295, %s1602_s14   ;;  %s1602_s14 = sphi %s1683_s14, %s27_s14   ;;  %s1598_s13 = sphi %s1681_s13, %s2188_s13   ;;  %s1594_s12 = sphi %s1679_s12, %s2187_s12   ;;  %s1590_s11 = sphi %s1677_s11, %s2186_s11   ;;  %s1586_s10 = sphi %s1675_s10, %s2185_s10   ;;  %s1582_s9 = sphi %s1673_s9, %s2184_s9   ;;  %s1578_s8 = sphi %s1671_s8, %s2183_s8   ;;  %s1574_s30 = sphi %s1669_s30, %s2182_s30   ;;  %s1570_s29 = sphi %s1667_s29, %s2181_s29   ;;  %s1566_s28 = sphi %s1665_s28, %s2180_s28   ;;  %s1562_s27 = sphi %s1663_s27, %s2179_s27   ;;  %s1558_s26 = sphi %s1661_s26, %s2178_s26   ;;  %s1554_s25 = sphi %s1659_s25, %s2177_s25   ;;  %s1550_s24 = sphi %s1657_s24, %s2173_s24  }
  0x15   : > { %2131 = sst [smem:[#allocation18_spill]] %s1554_s25  ;;  %s997_s16 = sadd.s32 4294967294, %s1602_s14  }
  0x16   : > { %2132 = sst [smem:[#allocation19_spill]] %s1586_s10  ;;  %p2115_p0 = scmp.eq.s32.totalorder %s1726_s15, 0 }
  0x17   : > { %2133 = sst [smem:[#allocation20_spill]] %s1590_s11  ;;  %p87_p1 = scmp.ne.s32.totalorder %s1566_s28, %s1562_s27 }
  0x18   : > { %p215_p2 = scmp.ne.s32.totalorder %s1558_s26, %s1554_s25  ;;  %p216_p3 = scmp.eq.s32.totalorder %s1726_s15, 7 }
  0x19   : > { %p1736_p4 = por %p87_p1, %p2115_p0  ;;  %p221_p5 = scmp.ne.s32.totalorder %s1554_s25, %s1550_s24 }
  0x1a   : > { %p1742_p6 = por %p216_p3, %p215_p2  ;;  %p222_p7 = scmp.eq.s32.totalorder %s997_s16, 7 }
  0x1b   : > { %s2134_s17 = scalar_select %p1736_p4, 1, 0 }
  0x1c   : > { %s2135_s18 = scalar_select %p1742_p6, 1, 0 }
  0x1d   : > { %p998_p8 = scmp.ge.s32.totalorder %s1602_s14, 1  ;;  %p229_p9 = scmp.lt.s32.totalorder %s1602_s14, 9 }
  0x1e   : > { %2136 = sst [smem:[#allocation21_spill]] %s2135_s18  ;;  %p1748_p10 = por %p222_p7, %p221_p5 }
  0x1f   : > { %p1752_p11 = pnand %p998_p8, %p229_p9  ;;  %s1604_s21 = smov [#allocation8]  }
  0x20   : > { %s2137_s19 = scalar_select %p1748_p10, 1, 0 }
  0x21   : > { %s2139_s20 = scalar_select %p1752_p11, 1, 0 }
  0x22   : > { %2138 = sst [smem:[#allocation22_spill]] %s2137_s19  ;;  %s244_s22 = sshll.u32 %s1604_s21, 4  ;;  %s245_s22 = int_to_ptr.vmem [resolvable:$true] %s244_s22 }
  0x23   : > { %p1130_p12 = pneg %p1752_p11  ;;  %s1605_s27 = smov [#allocation9]  }
  0x24   : > { %s260_s16 = sshll.u32 %s1605_s27, 4  ;;  %s2141_s3 = sld [smem:[#allocation26_spill]]  ;;  %s1764_s16 = int_to_ptr.vmem [resolvable:$true] %s260_s16 }
  0x25   : > { %p1760_p13 = pnand %p1130_p12, %p2115_p0 }
  0x27   : > { %p1330_p2 = pneg %p1760_p13 }
  0x2a   : > { %s1328_s7 = scalar_lea.hbm %s2141_s3, 2048 }
  0x2b   : > { %p1329_p1 = scmp.ne.s32.totalorder %s2141_s3, %s1328_s7  ;;  %p1335_p7 = scmp.lt.u32.totalorder %s1328_s7, %s2141_s3 }
  0x2d   : > { %p1331_p3 = pnand %p1330_p2, %p1329_p1 }
  0x2f   : > { %p1332_p5 = pneg %p1331_p3 }
  0x31   : > { %p1337_p8 = pnand %p1335_p7, %p1332_p5 }
  0x33   : > { %1340 = shalt.err (!%p1337_p8)
}
  0x34   : > { %s1341_s27 = scalar_lea.vmem %s245_s22, 2048  ;;  %p1349_p10 = scmp.lt.s32.totalorder %s245_s22, %s245_s22 }
  0x35   : > { %p1342_p9 = scmp.ne.s32.totalorder %s245_s22, %s1341_s27  ;;  %p1350_p6 = scmp.lt.s32.totalorder %s1341_s27, %s1341_s27 }
  0x37   : > { %p1344_p12 = pnand %p1342_p9, %p1330_p2  ;;  %p1351_p4 = por %p1350_p6, %p1349_p10 }
  0x39   : > { %p1345_p0 = pneg %p1344_p12 }
  0x3b   : > { %p1352_p11 = pnand %p1351_p4, %p1345_p0 }
  0x3d   : > { %1355 = shalt.err (!%p1352_p11)
}
  0x3e   : > { %s1606_s24 = smov 64   ;;  %s1607_s18 = smov 4  }
  0x3f   : > { %1133 = dma.hbm_to_vmem [thread:$0]  (!%p1760_p13), %s2141_s3, 2048, %s245_s22, [#allocation7], %s1606_s24, %s1606_s24, %s1607_s18  }
  0x40   : > { %s2142_s5 = sld [smem:[#allocation28_spill]] }
  0x46   : > { %s1356_s21 = scalar_lea.hbm %s2142_s5, 1024 }
  0x47   : > { %p1357_p1 = scmp.ne.s32.totalorder %s2142_s5, %s1356_s21  ;;  %p1363_p6 = scmp.lt.u32.totalorder %s1356_s21, %s2142_s5 }
  0x49   : > { %p1359_p0 = pnand %p1357_p1, %p1330_p2 }
  0x4b   : > { %p1360_p4 = pneg %p1359_p0 }
  0x4d   : > { %p1365_p10 = pnand %p1363_p6, %p1360_p4 }
  0x4f   : > { %1368 = shalt.err (!%p1365_p10)
}
  0x50   : > { %s1369_s22 = scalar_lea.vmem %s1764_s16, 1024  ;;  %p1377_p7 = scmp.lt.s32.totalorder %s1764_s16, %s1764_s16 }
  0x51   : > { %p1370_p11 = scmp.ne.s32.totalorder %s1764_s16, %s1369_s22  ;;  %p1378_p8 = scmp.lt.s32.totalorder %s1369_s22, %s1369_s22 }
  0x53   : > { %p1372_p3 = pnand %p1370_p11, %p1330_p2  ;;  %p1379_p9 = por %p1378_p8, %p1377_p7 }
  0x55   : > { %p1373_p5 = pneg %p1372_p3 }
  0x57   : > { %p1380_p12 = pnand %p1379_p9, %p1373_p5 }
  0x59   : > { %1383 = shalt.err (!%p1380_p12)
}
  0x5a   : > { %1136 = dma.hbm_to_vmem [thread:$0]  (!%p1760_p13), %s2142_s5, 1024, %s1764_s16, [#allocation10], %s1606_s24, %s1606_s24, %s1607_s18  }
  0x5b   : > { %s36_s10 = sadd.s32 1, %s1594_s12  ;;  %s39_s23 = sadd.s32 1, %s1598_s13 }
  0x5c   : > { %p37_p2 = scmp.ge.s32.totalorder %s36_s10, 4  ;;  %s48_s6 = sadd.s32 1, %s1582_s9 }
  0x5d   : > { %p55_p1 = scmp.ne.s32.totalorder %s1582_s9, %s1578_s8  ;;  %p56_p0 = scmp.eq.s32.totalorder %s1602_s14, 0 }
  0x5e   : > { %s2190_s10 = smov (%p37_p2, %s36_s10), 0  ;;  %s2192_s23 = smov (!%p37_p2, %s39_s23), %s1598_s13 }
  0x5f   : > { %2143 = sst [smem:[#allocation23_spill]] %s2190_s10  ;;  %s44_s7 = ssub.s32 %s1594_s12, %s2190_s10 }
  0x60   : > { %p41_p13 = scmp.ge.s32.totalorder %s2192_s23, 2  ;;  %p61_p4 = scmp.ne.s32.totalorder %s1578_s8, %s1574_s30 }
  0x61   : > { %p1828_p6 = por %p56_p0, %p55_p1  ;;  %p72_p10 = scmp.eq.s32.totalorder %s44_s7, 0 }
  0x62   : > { %s2194_s23 = smov (%p41_p13, %s2192_s23), 0  ;;  %p2146_p11 = scmp.eq.s32.totalorder %s1726_s15, 0 }
  0x63   : > { %2145 = sst [smem:[#allocation24_spill]] %s2194_s23  ;;  %s74_s18 = sadd.s32 1, %s1570_s29 }
  0x64   : > { %p1836_p3 = por %p2146_p11, %p61_p4  ;;  %s43_s30 = ssub.s32 %s1598_s13, %s2194_s23 }
  0x65   : > { %p81_p5 = scmp.ne.s32.totalorder %s1570_s29, %s1566_s28  ;;  %s45_s11 = sor.u32 %s44_s7, %s43_s30 }
  0x66   : > { %s2147_s24 = scalar_select %p1836_p3, 1, 0 }
  0x67   : > { %p203_p7 = scmp.eq.s32.totalorder %s43_s30, 0  ;;  %p46_p8 = scmp.eq.s32.totalorder %s45_s11, 0 }
  0x68   : > { %p1847_p9 = por %p81_p5, %p56_p0  ;;  %s205_s22 = sadd.s32 1, %s1558_s26 }
  0x69   : > { %s1852_s21 = scalar_select %p72_p10, %s1570_s29, %s74_s18  }
  0x6a   : > { %s1855_s27 = scalar_select %p46_p8, %s1582_s9, %s48_s6  }
  0x6b   : > { %p1150_p12 = scmp.lt.s32.totalorder %s1602_s14, 8  ;;  %s277_s4 = sand.u32 1, %s1582_s9  }
  0x6c   : > { %s1860_s2 = scalar_select %p203_p7, %s1558_s26, %s205_s22  }
  0x6d   : > { %s1003_s7 = sshll.u32 %s1598_s13, 2  ;;  %s1002_s30 = sshll.u32 %s277_s4, 3 }
  0x6e   : > { %s286_s11 = sadd.s32 %s1594_s12, %s1003_s7  ;;  %s281_s5 = scalar_lea.vmem [#allocation3], %s1002_s30 }
  0x6f   : > { %s1004_s3 = sshll.u32 %s286_s11, 7  ;;  %s290_s23 = sshll.u32 %s281_s5, 4  ;;  %s1870_s23 = int_to_ptr.vmem [resolvable:$true] %s290_s23 }
  0x70   : > { %s1868_s18 = scalar_lea.hbm %s2102_s0, %s1004_s3  ;;  %p1874_p2 = pnand %p1150_p12, %p1828_p6 }
  0x71   : > { %p1880_p1 = pnand %p1150_p12, %p1847_p9  ;;  %s297_s3 = sand.u32 1, %s1602_s14  }
  0x72   : > { %s299_s25 = sand.u32 1, %s1570_s29   ;;  %s278_s10 = scalar_lea.sflag [#allocation4], %s277_s4 }
  0x73   : > { %s1384_s22 = scalar_lea.hbm %s1868_s18, 128  ;;  %p1386_p13 = pneg %p1874_p2 }
  0x74   : > { %p1385_p0 = scmp.ne.s32.totalorder %s1868_s18, %s1384_s22  ;;  %s1389_s19 = scalar_lea.hbm %s2102_s0, 1024 }
  0x75   : > { %p1390_p10 = scmp.lt.u32.totalorder %s1868_s18, %s2102_s0  ;;  %p1391_p11 = scmp.lt.u32.totalorder %s1389_s19, %s1384_s22 }
  0x76   : > { %p1387_p4 = pnand %p1386_p13, %p1385_p0  ;;  %p1393_p7 = scmp.lt.u32.totalorder %s1384_s22, %s1868_s18 }
  0x77   : > { %p1392_p5 = por %p1391_p11, %p1390_p10 }
  0x78   : > { %p1388_p6 = pneg %p1387_p4 }
  0x79   : > { %p1394_p8 = por %p1393_p7, %p1392_p5 }
  0x7b   : > { %p1395_p9 = pnand %p1394_p8, %p1388_p6 }
  0x7d   : > { %1398 = shalt.err (!%p1395_p9)
}
  0x7e   : > { %s1399_s4 = scalar_lea.vmem %s1870_s23, 128  ;;  %s1608_s16 = smov [#allocation3]  }
  0x7f   : > { %p1400_p12 = scmp.ne.s32.totalorder %s1870_s23, %s1399_s4  ;;  %s1404_s7 = sshll.u32 %s1608_s16, 4  ;;  %s1405_s7 = int_to_ptr.vmem [resolvable:$false] %s1404_s7 }
  0x80   : > { %s1406_s30 = scalar_lea.vmem %s1405_s7, 256  ;;  %p1407_p3 = scmp.lt.s32.totalorder %s1870_s23, %s1405_s7 }
  0x81   : > { %p1402_p0 = pnand %p1400_p12, %p1386_p13  ;;  %p1408_p10 = scmp.lt.s32.totalorder %s1406_s30, %s1399_s4 }
  0x83   : > { %p1403_p4 = pneg %p1402_p0  ;;  %p1409_p11 = por %p1408_p10, %p1407_p3 }
  0x85   : > { %p1410_p5 = pnand %p1409_p11, %p1403_p4 }
  0x87   : > { %1413 = shalt.err (!%p1410_p5)
}
  0x88   : > { %1140 = dma.hbm_to_vmem [thread:$0]  (!%p1874_p2), %s1868_s18, 128, %s1870_s23, %s278_s10  }
  0x89   : > { %s1005_s22 = sshll.u32 %s299_s25, 7  ;;  %s1064_s19 = sshll.u32 %s1594_s12, 11 }
  0x8a   : > { %s1917_s4 = scalar_lea.hbm %s2103_s1, %s1064_s19  ;;  %s301_s6 = scalar_lea.vmem [#allocation6], %s1005_s22 }
  0x8b   : > { %s309_s7 = sshll.u32 %s301_s6, 4  ;;  %s1923_s30 = scalar_lea.sflag [#allocation7], %s297_s3  ;;  %s1919_s7 = int_to_ptr.vmem [resolvable:$true] %s309_s7 }
  0x8c   : > { %s1414_s23 = scalar_lea.hbm %s1917_s4, 2048  ;;  %p1416_p2 = pneg %p1880_p1 }
  0x8d   : > { %p1415_p3 = scmp.ne.s32.totalorder %s1917_s4, %s1414_s23  ;;  %s1419_s10 = scalar_lea.hbm %s2103_s1, 8192 }
  0x8e   : > { %p1420_p7 = scmp.lt.u32.totalorder %s1917_s4, %s2103_s1  ;;  %p1421_p8 = scmp.lt.u32.totalorder %s1419_s10, %s1414_s23 }
  0x8f   : > { %p1417_p13 = pnand %p1416_p2, %p1415_p3  ;;  %p1423_p12 = scmp.lt.u32.totalorder %s1414_s23, %s1917_s4 }
  0x90   : > { %p1422_p9 = por %p1421_p8, %p1420_p7 }
  0x91   : > { %p1418_p6 = pneg %p1417_p13 }
  0x92   : > { %p1424_p0 = por %p1423_p12, %p1422_p9 }
  0x94   : > { %p1425_p4 = pnand %p1424_p0, %p1418_p6 }
  0x96   : > { %1428 = shalt.err (!%p1425_p4)
}
  0x97   : > { %s1429_s3 = scalar_lea.vmem %s1919_s7, 2048  ;;  %s1609_s11 = smov [#allocation6]  }
  0x98   : > { %p1430_p10 = scmp.ne.s32.totalorder %s1919_s7, %s1429_s3  ;;  %s1434_s16 = sshll.u32 %s1609_s11, 4  ;;  %s1435_s16 = int_to_ptr.vmem [resolvable:$false] %s1434_s16 }
  0x99   : > { %s1436_s6 = scalar_lea.vmem %s1435_s16, 4096  ;;  %p1437_p3 = scmp.lt.s32.totalorder %s1919_s7, %s1435_s16 }
  0x9a   : > { %p1432_p11 = pnand %p1430_p10, %p1416_p2  ;;  %p1438_p13 = scmp.lt.s32.totalorder %s1436_s6, %s1429_s3 }
  0x9c   : > { %p1433_p5 = pneg %p1432_p11  ;;  %p1439_p7 = por %p1438_p13, %p1437_p3 }
  0x9e   : > { %p1440_p8 = pnand %p1439_p7, %p1433_p5 }
  0xa0   : > { %1443 = shalt.err (!%p1440_p8)
}
  0xa1   : > { %s1610_s23 = smov 128   ;;  %s1611_s18 = smov 8  }
  0xa2   : > { %1143 = dma.hbm_to_vmem [thread:$0]  (!%p1880_p1), %s1917_s4, 2048, %s1919_s7, %s1923_s30, %s1610_s23, %s1610_s23, %s1611_s18  }
  0xa3   : > { %p2151_p2 = scmp.ne.s32.totalorder %s2139_s20, 0 }
  0xa4   : > { %s323_s25 = sand.u32 (!%p2151_p2), 1, %s1578_s8   ;;  %p2152_p6 = scmp.ne.s32.totalorder (!%p2151_p2), %s2147_s24, 0 }
  0xa5   : > { %321 = sbr.rel (%p2151_p2) target bundleno = 1241 (0x4d9), region = 48  ;;  %s1954_s10 = sshll.u32 (!%p2151_p2), %s323_s25, 3 }
  0xa6   : > { %s324_s19 = scalar_lea.sflag (!%p2151_p2), [#allocation4], %s323_s25  ;;  %s327_s22 = scalar_lea.vmem (!%p2151_p2), [#allocation3], %s1954_s10 }
  0xac   : > { %1529 = dma.done.wait (%p2152_p6), %s324_s19, 128  }
  0xad   : > { %1531 = vsyncadd (%p2152_p6), %s324_s19, 4294967168  ;;  %s332_s5 = sand.u32 1, %s1726_s15   ;;  %s334_s4 = sand.u32 1, %s1566_s28  }
  0xae   : > { %s1011_s20 = sshll.u32 %s334_s4, 7  ;;  %s333_s7 = scalar_lea.sflag [#allocation7], %s332_s5 }
  0xaf   : > { %s1963_s30 = scalar_lea.vmem [#allocation6], %s1011_s20  ;;  %p2153_p1 = scmp.ne.s32.totalorder %s2134_s17, 0 }
  0xb1   : > { %1533 = dma.done.wait (%p2153_p1), %s333_s7, 2048  }
  0xb2   : > { %1535 = vsyncadd (%p2153_p1), %s333_s7, 4294965248  ;;  %p2154_p9 = scmp.eq.s32.totalorder %s1726_s15, 0 }
  0xb4   : > { %1537 = dma.done.wait (%p2154_p9), [#allocation7], 2048   ;;  %p2155_p12 = pmov %p2154_p9 }
  0xb5   : > { %p2156_p0 = pmov %p2154_p9 }
  0xb6   : > { %1539 = vsyncadd (%p2155_p12), [#allocation7], 4294965248 }
  0xb7   : > { %1541 = dma.done.wait (%p2156_p0), [#allocation10], 1024   ;;  %p2157_p4 = pmov %p2156_p0 }
  0xb8   : > { %s2158_s24 = sld [smem:[#allocation18_spill]]  ;;  %s2159_s16 = sld [smem:[#allocation19_spill]] }
  0xb9   : > { %1543 = vsyncadd (%p2157_p4), [#allocation10], 4294966272 }
  0xbe   : > { %s377_s3 = sand.u32 1, %s2158_s24   ;;  %p1015_p10 = scmp.ne.s32.totalorder %s2159_s16, 0 }
  0xbf   : > { %s1980_s11 = sshll.u32 %s377_s3, 3  ;;  %v1612_v0 = vmov (!%p1015_p10), 0.0  }
  0xc0   : > { %s379_s17 = scalar_lea.vmem [#allocation11], %s1980_s11  ;;  %385 = sbr.rel (%p1015_p10) target bundleno = 199 (0xc7), region = 68  ;;  %386 = vst [vmem:[#allocation2] sm:$0xff] (!%p1015_p10), %v1612_v0  ;;  %387 = vst [vmem:[#allocation2 + $0x8] sm:$0xff] (!%p1015_p10), %v1612_v0 }
  0xc7 PF: > { %v1276_v1 = vld [vmem:[%s1963_s30 + $0x4] ss:$8 sps:$4 sm:$0xff]   ;;  %v1278_v2 = vld [vmem:[%s1963_s30] ss:$8 sps:$4 sm:$0xff]   ;;  %v1613_v3 = vmov 0   ;;  %v390_v18 = vld [vmem:[%s327_s22] sm:$0xff] }
  0xc8   : > { %520 = vmatprep.mubr.bf16.mxu0 %v1613_v3  ;;  %488 = vmatprep.subr.bf16.mxu0 %v1276_v1  ;;  %v1279_v4 = vld [vmem:[%s1963_s30 + $0x14] ss:$8 sps:$4 sm:$0xff]   ;;  %v1281_v5 = vld [vmem:[%s1963_s30 + $0x10] ss:$8 sps:$4 sm:$0xff]   ;;  %v1282_v6 = vld [vmem:[%s1963_s30 + $0x24] ss:$8 sps:$4 sm:$0xff]   ;;  %v391_v19 = vpack.c.bf16 %v390_v18, %v390_v18 }
  0xc9   : > { %489 = vmatpush1.bf16.msra.mxu0 %v1278_v2  ;;  %v1284_v7 = vld [vmem:[%s1963_s30 + $0x20] ss:$8 sps:$4 sm:$0xff]   ;;  %v1285_v8 = vld [vmem:[%s1963_s30 + $0x34] ss:$8 sps:$4 sm:$0xff]   ;;  %v1287_v9 = vld [vmem:[%s1963_s30 + $0x30] ss:$8 sps:$4 sm:$0xff]  }
  0xca   : > { %490 = vmatprep.subr.bf16.mxu0 %v1279_v4  ;;  %v1288_v10 = vld [vmem:[%s1963_s30 + $0x44] ss:$8 sps:$4 sm:$0xff]   ;;  %v1290_v11 = vld [vmem:[%s1963_s30 + $0x40] ss:$8 sps:$4 sm:$0xff]   ;;  %v1291_v12 = vld [vmem:[%s1963_s30 + $0x54] ss:$8 sps:$4 sm:$0xff]  }
  0xcb   : > { %v1293_v13 = vld [vmem:[%s1963_s30 + $0x50] ss:$8 sps:$4 sm:$0xff]   ;;  %v1294_v14 = vld [vmem:[%s1963_s30 + $0x64] ss:$8 sps:$4 sm:$0xff]   ;;  %v1296_v15 = vld [vmem:[%s1963_s30 + $0x60] ss:$8 sps:$4 sm:$0xff]  }
  0xcc   : > { %v1297_v16 = vld [vmem:[%s1963_s30 + $0x74] ss:$8 sps:$4 sm:$0xff]   ;;  %v1299_v17 = vld [vmem:[%s1963_s30 + $0x70] ss:$8 sps:$4 sm:$0xff]   ;;  %v388_v20 = vld [vmem:[#allocation2] sm:$0xff]  ;;  %s2160_s15 = sld [smem:[#allocation19_spill]] }
  0xcd   : > { %491 = vmatpush1.bf16.msra.mxu0 %v1281_v5  ;;  %v389_v21 = vld [vmem:[#allocation2 + $0x8] sm:$0xff] }
  0xce   : > { %492 = vmatprep.subr.bf16.mxu0 %v1282_v6 }
  0xd1   : > { %493 = vmatpush1.bf16.msra.mxu0 %v1284_v7 }
  0xd2   : > { %494 = vmatprep.subr.bf16.mxu0 %v1285_v8  ;;  %p1032_p11 = scmp.ne.s32.totalorder %s2160_s15, 3 }
  0xd3   : > { %v1300_v28 = vld [vmem:[#allocation8 + $0x40] sm:$0xff] (!%p1032_p11)   ;;  %v1614_v30 = vmov (!%p1032_p11), 0.0   ;;  %v1302_v31 = vld [vmem:[#allocation8 + $0x48] sm:$0xff] (!%p1032_p11)   ;;  %v1304_v33 = vld [vmem:[#allocation8 + $0x50] sm:$0xff] (!%p1032_p11)   ;;  %v541_v34 = vlaneseq (!%p1032_p11)  ;;  %s2161_s18 = sld [smem:[#allocation25_spill]] (!%p1032_p11)  ;;  %vm1615_vm0 = vmmov (!%p1032_p11), 0  }
  0xd4   : > { %v1301_v29 = vld [vmem:[#allocation8] sm:$0xff] (!%p1032_p11)   ;;  %1096 = vmatprep.subr.bf16.mxu1 (!%p1032_p11), %v1614_v30  ;;  %v1303_v32 = vld [vmem:[#allocation8 + $0x8] sm:$0xff] (!%p1032_p11)   ;;  %v1305_v35 = vld [vmem:[#allocation8 + $0x10] sm:$0xff] (!%p1032_p11)   ;;  %1112 = vmatprep.mubr.msk.bf16.mxu1 (!%p1032_p11), %vm1615_vm0, %v1614_v30  ;;  %s2162_s19 = sld [smem:[#allocation27_spill]] (!%p1032_p11)  ;;  %s2163_s4 = sld [smem:[#allocation29_spill]] (!%p1032_p11) }
  0xd5   : > { %495 = vmatpush1.bf16.msra.mxu0 %v1287_v9  ;;  %v1306_v36 = vld [vmem:[#allocation8 + $0x58] sm:$0xff] (!%p1032_p11)   ;;  %v542_v37 = vshrl.u32 (!%p1032_p11), %v541_v34, 7  ;;  %v1308_v39 = vld [vmem:[#allocation8 + $0x60] sm:$0xff] (!%p1032_p11)   ;;  %v1310_v43 = vld [vmem:[#allocation8 + $0x68] sm:$0xff] (!%p1032_p11)  }
  0xd6   : > { %496 = vmatprep.subr.bf16.mxu0 %v1288_v10  ;;  %v1307_v38 = vld [vmem:[#allocation8 + $0x18] sm:$0xff] (!%p1032_p11)   ;;  %v1309_v42 = vld [vmem:[#allocation8 + $0x20] sm:$0xff] (!%p1032_p11)   ;;  %v1311_v46 = vld [vmem:[#allocation8 + $0x28] sm:$0xff] (!%p1032_p11)  }
  0xd7   : > { %v547_v40 = vsub.s32 (!%p1032_p11), 1, %v542_v37  ;;  %v543_v41 = vsub.s32 (!%p1032_p11), 0, %v542_v37  ;;  %v1316_v48 = vld [vmem:[#allocation9] sm:$0xff] (!%p1032_p11)   ;;  %v1317_v52 = vld [vmem:[#allocation9 + $0x8] sm:$0xff] (!%p1032_p11)   ;;  %v1312_v53 = vld [vmem:[#allocation8 + $0x70] sm:$0xff] (!%p1032_p11)  }
  0xd8   : > { %1097 = vmatpush3.bf16.msra.mxu1 (!%p1032_p11), %v1316_v48  ;;  %v1313_v55 = vld [vmem:[#allocation8 + $0x30] sm:$0xff] (!%p1032_p11)   ;;  %v1314_v59 = vld [vmem:[#allocation8 + $0x78] sm:$0xff] (!%p1032_p11)   ;;  %v1320_v0 = vld [vmem:[#allocation9 + $0x20] sm:$0xff] (!%p1032_p11)  }
  0xd9   : > { %497 = vmatpush1.bf16.msra.mxu0 %v1290_v11  ;;  %v539_v45 = vld [vmem:[%s2161_s18] sm:$0x3] (!%p1032_p11)  ;;  %1098 = vmatprep.subr.bf16.mxu1 (!%p1032_p11), %v1614_v30  ;;  %v1318_v58 = vld [vmem:[#allocation9 + $0x10] sm:$0xff] (!%p1032_p11)   ;;  %v1315_v61 = vld [vmem:[#allocation8 + $0x38] sm:$0xff] (!%p1032_p11)  }
  0xda   : > { %498 = vmatprep.subr.bf16.mxu0 %v1291_v12  ;;  %v548_v47 = vrot.slane (!%p1032_p11), %v539_v45, %v547_v40  ;;  %v544_v49 = vrot.slane (!%p1032_p11), %v539_v45, %v543_v41  ;;  %v1319_v62 = vld [vmem:[#allocation9 + $0x18] sm:$0xff] (!%p1032_p11)   ;;  %v1321_v1 = vld [vmem:[#allocation9 + $0x28] sm:$0xff] (!%p1032_p11)   ;;  %v1322_v2 = vld [vmem:[#allocation9 + $0x30] sm:$0xff] (!%p1032_p11)  }
  0xdb   : > { %v1323_v3 = vld [vmem:[#allocation9 + $0x38] sm:$0xff] (!%p1032_p11)   ;;  %v1033_v5 = vld [vmem:[%s2162_s19] ss:$0 sm:$0xff] (!%p1032_p11) }
  0xdc   : > { %1099 = vmatpush3.bf16.msra.mxu1 (!%p1032_p11), %v1317_v52 }
  0xdd   : > { %499 = vmatpush1.bf16.msra.mxu0 %v1293_v13  ;;  %1100 = vmatprep.subr.bf16.mxu1 (!%p1032_p11), %v1614_v30  ;;  %v1050_v13 = vld [vmem:[%s2163_s4] ss:$0 sm:$0xff] (!%p1032_p11) }
  0xde   : > { %500 = vmatprep.subr.bf16.mxu0 %v1294_v14 }
  0xe0   : > { %1101 = vmatpush3.bf16.msra.mxu1 (!%p1032_p11), %v1318_v58 }
  0xe1   : > { %501 = vmatpush1.bf16.msra.mxu0 %v1296_v15  ;;  %1102 = vmatprep.subr.bf16.mxu1 (!%p1032_p11), %v1614_v30 }
  0xe2   : > { %502 = vmatprep.subr.bf16.mxu0 %v1297_v16 }
  0xe4   : > { %1103 = vmatpush3.bf16.msra.mxu1 (!%p1032_p11), %v1319_v62 }
  0xe5   : > { %503 = vmatpush1.bf16.msra.mxu0 %v1299_v17  ;;  %1104 = vmatprep.subr.bf16.mxu1 (!%p1032_p11), %v1614_v30 }
  0xe6   : > { %1065 = vmatprep.subr.bf16.mxu0 (!%p1032_p11), %v1300_v28 }
  0xe8   : > { %521 = vmatmul.mubr.bf16.vlgmr.msra.gmra.mrb[0].mxu0 %v391_v19  ;;  %1105 = vmatpush3.bf16.msra.mxu1 (!%p1032_p11), %v1320_v0 }
  0xe9   : > { %1066 = vmatpush3.bf16.msra.mxu0 (!%p1032_p11), %v1301_v29  ;;  %1106 = vmatprep.subr.bf16.mxu1 (!%p1032_p11), %v1614_v30 }
  0xea   : > { %1067 = vmatprep.subr.bf16.mxu0 (!%p1032_p11), %v1302_v31 }
  0xec   : > { %1107 = vmatpush3.bf16.msra.mxu1 (!%p1032_p11), %v1321_v1 }
  0xed   : > { %1068 = vmatpush3.bf16.msra.mxu0 (!%p1032_p11), %v1303_v32  ;;  %1108 = vmatprep.subr.bf16.mxu1 (!%p1032_p11), %v1614_v30 }
  0xee   : > { %1069 = vmatprep.subr.bf16.mxu0 (!%p1032_p11), %v1304_v33 }
  0xf0   : > { %1109 = vmatpush3.bf16.msra.mxu1 (!%p1032_p11), %v1322_v2 }
  0xf1   : > { %1070 = vmatpush3.bf16.msra.mxu0 (!%p1032_p11), %v1305_v35  ;;  %1110 = vmatprep.subr.bf16.mxu1 (!%p1032_p11), %v1614_v30 }
  0xf2   : > { %1071 = vmatprep.subr.bf16.mxu0 (!%p1032_p11), %v1306_v36 }
  0xf4   : > { %1111 = vmatpush3.bf16.msra.mxu1 (!%p1032_p11), %v1323_v3 }
  0xf5   : > { %1072 = vmatpush3.bf16.msra.mxu0 (!%p1032_p11), %v1307_v38 }
  0xf6   : > { %1073 = vmatprep.subr.bf16.mxu0 (!%p1032_p11), %v1308_v39 }
  0xf9   : > { %1074 = vmatpush3.bf16.msra.mxu0 (!%p1032_p11), %v1309_v42 }
  0xfa   : > { %1075 = vmatprep.subr.bf16.mxu0 (!%p1032_p11), %v1310_v43 }
  0xfd   : > { %1076 = vmatpush3.bf16.msra.mxu0 (!%p1032_p11), %v1311_v46 }
  0xfe   : > { %1077 = vmatprep.subr.bf16.mxu0 (!%p1032_p11), %v1312_v53 }
 0x101   : > { %1078 = vmatpush3.bf16.msra.mxu0 (!%p1032_p11), %v1313_v55 }
 0x102   : > { %1079 = vmatprep.subr.bf16.mxu0 (!%p1032_p11), %v1314_v59 }
 0x105   : > { %1080 = vmatpush3.bf16.msra.mxu0 (!%p1032_p11), %v1315_v61 }
 0x1b9   : > { %536 = sbr.rel (%p1032_p11) target bundleno = 1214 (0x4be), region = 72 }
 0x1bb   : > { %v522_v22 = vpop.f32.mrb[0].mxu0 }
 0x1bc   : > { %v529_v23 = vadd.f32 %v522_v22, %v388_v20  ;;  %v524_v24 = vpop.f32.mrb[1].mxu0 }
 0x1bd   : > { %v530_v25 = vadd.f32 %v524_v24, %v389_v21  ;;  %v526_v26 = vpop.f32.mrb[2].mxu0 }
 0x1be   : > { %531 = vst [vmem:[#allocation2] sm:$0xff] %v529_v23  ;;  %v527_v27 = vpop.f32.mrb[3].mxu0 }
 0x1bf   : > { %532 = vst [vmem:[#allocation2 + $0x8] sm:$0xff] %v530_v25 }
 0x1c5   : > { %v537_v50 = vld [vmem:[#allocation2] sm:$0xff] }
 0x1c6   : > { %v538_v44 = vld [vmem:[#allocation2 + $0x8] sm:$0xff]  ;;  %v551_v56 = vadd.f32 %v544_v49, %v537_v50 }
 0x1c7   : > { %v552_v51 = vadd.f32 %v548_v47, %v538_v44 }
 0x1c8   : > { %v553_v60 = vmax.f32 %v551_v56, 0.0 }
 0x1c9   : > { %v554_v54 = vmax.f32 %v552_v51, 0.0 }
 0x1ca   : > { %v555_v63 = vpack.c.bf16 %v553_v60, %v553_v60 }
 0x1cb   : > { %v556_v57 = vpack.c.bf16 %v554_v54, %v554_v54 }
 0x1cd   : > { %724 = vmatprep.mubr.bf16.mxu0 %v556_v57 }
 0x1ce   : > { %725 = vmatmul.mubr.bf16.vlgmr.msra.gmra.mrb[0].mxu0 %v555_v63 }
 0x2a1   : > { %v1081_v4 = vpop.f32.mrb[0].mxu0 }
 0x2a2   : > { %v1082_v6 = vpop.f32.mrb[1].mxu0 }
 0x2a3   : > { %v1083_v7 = vadd.f32 %v1082_v6, %v1081_v4  ;;  %v1084_v8 = vpop.f32.mrb[2].mxu0 }
 0x2a4   : > { %v1085_v9 = vpop.f32.mrb[3].mxu0 }
 0x2a5   : > { %v727_v10 = vadd.f32 %v1083_v7, %v1033_v5 }
 0x2a7   : > { %v732_v11 = vmax.f32 %v727_v10, 0.0 }
 0x2a9   : > { %v733_v12 = vpack.c.bf16 %v732_v11, %v732_v11 }
 0x2ab   : > { %1113 = vmatmul.mubr.bf16.vlgmr.msra.gmra.mrb[0].mxu1 %v733_v12 }
 0x37e   : > { %v839_v14 = vpop.f32.mrb[0].mxu1 }
 0x37f   : > { %v840_v15 = vadd.f32 %v1050_v13, %v839_v14  ;;  %v1114_v16 = vpop.f32.mrb[1].mxu1 }
 0x380   : > { %v842_v17 = vpop.f32.mrb[2].mxu1 }
 0x381   : > { %845 = vmax.xlane.f32.xlu0 %v840_v15  ;;  %v1115_v18 = vpop.f32.mrb[3].mxu1 }
 0x40e   : > { %v846_v19 = vpop.xlane.xlu0 %845 }
 0x40f   : > { %v847_v20 = vsub.f32 %v840_v15, %v846_v19 }
 0x411   : > { %v848_v21 = vmul.f32 1.442695, %v847_v20 }
 0x413   : > { %1324 = vpow2.f32 %v848_v21 }
 0x41d   : > { %v1325_v22 = vpop.eup %1324 }
 0x41e   : > { %850 = vadd.xlane.f32.xlu0 %v1325_v22 }
 0x4ab   : > { %v851_v23 = vpop.xlane.xlu0 %850 }
 0x4ac   : > { %1326 = vlog2.f32 %v851_v23 }
 0x4b6   : > { %v1327_v24 = vpop.eup %1326 }
 0x4b7   : > { %v853_v25 = vmul.f32 0.6931472, %v1327_v24 }
 0x4b9   : > { %v854_v26 = vadd.f32 %v853_v25, %v846_v19 }
 0x4bb   : > { %v855_v27 = vsub.f32 %v840_v15, %v854_v26 }
 0x4bd   : > { %856 = vst [vmem:[%s379_s17] sm:$0xff] %v855_v27 }
 0x4be PF: > { %s2164_s20 = sld [smem:[#allocation20_spill]]  ;;  %s2166_s30 = sld [smem:[#allocation21_spill]] }
 0x4bf   : > { %s2167_s6 = sld [smem:[#allocation30_spill]]  ;;  %s871_s18 = sshll.u32 %s379_s17, 4  ;;  %s872_s18 = int_to_ptr.vmem [resolvable:$true] %s871_s18 }
 0x4c0   : > { %s858_s25 = scalar_lea.sflag [#allocation5], %s377_s3  ;;  %s1444_s10 = scalar_lea.vmem %s872_s18, 128 }
 0x4c1   : > { %p1445_p5 = scmp.ne.s32.totalorder %s872_s18, %s1444_s10  ;;  %s1616_s19 = smov [#allocation11]  }
 0x4c2   : > { %s1448_s22 = sshll.u32 %s1616_s19, 4  ;;  %s1449_s22 = int_to_ptr.vmem [resolvable:$false] %s1448_s22 }
 0x4c3   : > { %s1450_s5 = scalar_lea.vmem %s1449_s22, 256  ;;  %p1451_p8 = scmp.lt.s32.totalorder %s872_s18, %s1449_s22 }
 0x4c4   : > { %s1060_s24 = sshll.u32 %s2164_s20, 7  ;;  %p2168_p3 = scmp.ne.s32.totalorder %s2166_s30, 0 }
 0x4c5   : > { %s2027_s23 = scalar_lea.hbm %s2167_s6, %s1060_s24  ;;  %p1452_p2 = scmp.lt.s32.totalorder %s1450_s5, %s1444_s10 }
 0x4c6   : > { %p1446_p13 = pnand %p1445_p5, %p2168_p3 }
 0x4c7   : > { %p1453_p6 = por %p1452_p2, %p1451_p8 }
 0x4c8   : > { %p1447_p7 = pneg %p1446_p13 }
 0x4ca   : > { %p1454_p1 = pnand %p1453_p6, %p1447_p7 }
 0x4cc   : > { %1457 = shalt.err (!%p1454_p1)
}
 0x4cd   : > { %s1458_s3 = scalar_lea.hbm %s2027_s23, 128  ;;  %s1462_s4 = scalar_lea.hbm %s2167_s6, 256 }
 0x4ce   : > { %p1459_p9 = scmp.ne.s32.totalorder %s2027_s23, %s1458_s3  ;;  %p1463_p4 = scmp.lt.u32.totalorder %s2027_s23, %s2167_s6 }
 0x4cf   : > { %p1464_p10 = scmp.lt.u32.totalorder %s1462_s4, %s1458_s3  ;;  %p1466_p5 = scmp.lt.u32.totalorder %s1458_s3, %s2027_s23 }
 0x4d0   : > { %p1460_p12 = pnand %p1459_p9, %p2168_p3 }
 0x4d1   : > { %p1465_p11 = por %p1464_p10, %p1463_p4 }
 0x4d2   : > { %p1461_p0 = pneg %p1460_p12 }
 0x4d3   : > { %p1467_p13 = por %p1466_p5, %p1465_p11 }
 0x4d5   : > { %p1468_p7 = pnand %p1467_p13, %p1461_p0 }
 0x4d7   : > { %1471 = shalt.err (!%p1468_p7)
}
 0x4d8   : > { %1128 = dma.vmem_to_hbm [thread:$0]  (%p2168_p3), %s872_s18, 128, %s2027_s23, %s858_s25  }
 0x4d9 PF: > { %s2169_s24 = sld [smem:[#allocation17_spill]]  ;;  %s2170_s16 = sld [smem:[#allocation22_spill]] }
 0x4da   : > { %p1153_p8 = scmp.ge.s32.totalorder %s1602_s14, 2 }
 0x4df   : > { %s883_s15 = sand.u32 1, %s2169_s24   ;;  %p2171_p2 = scmp.ne.s32.totalorder %s2170_s16, 0 }
 0x4e0   : > { %s884_s10 = scalar_lea.sflag [#allocation5], %s883_s15 }
 0x4e1   : > { %p1145_p6 = pnand %p1153_p8, %p2171_p2 }
 0x4e3   : > { %1545 = dma.done.wait (!%p1145_p6), %s884_s10, 128  }
 0x4e4   : > { %1547 = vsyncadd (!%p1145_p6), %s884_s10, 4294967168  ;;  %s27_s14 = sadd.s32 1, %s1602_s14   ;;  %s2173_s24 = sld [smem:[#allocation18_spill]] }
 0x4e5   : > { %p2055_p1 = scmp.ge.s32.totalorder %s27_s14, 10   ;;  %s2174_s23 = smov %s1855_s27 }
 0x4e6   : > { %s2175_s18 = sld [smem:[#allocation23_spill]]  ;;  %s2176_s22 = sld [smem:[#allocation24_spill]] }
 0x4e7   : > { %s2177_s25 = smov %s1558_s26  ;;  %s2178_s26 = smov %s1860_s2 }
 0x4e8   : > { %s2179_s27 = smov %s1566_s28  ;;  %s2180_s28 = smov %s1570_s29 }
 0x4e9   : > { %s2181_s29 = smov %s1852_s21  ;;  %s2182_s30 = smov %s1578_s8 }
 0x4ea   : > { %s2183_s8 = smov %s1582_s9  ;;  %s2184_s9 = smov %s2174_s23 }
 0x4eb   : > { %s2185_s10 = smov %s1594_s12  ;;  %s2186_s11 = smov %s1598_s13 }
 0x4ec   : > { %s2187_s12 = smov %s2175_s18  ;;  %s2188_s13 = smov %s2176_s22 }
 0x4ed   :  { %26 = sbr.rel (!%p2055_p1) target bundleno = 20 (0x14), region = 122 }
 0x4f4   :  { %889 = vsyncpa [#allocation4], 1 }
 0x4f5   :  { %891 = vsyncpa [#allocation4 + $0x1], 1 }
 0x4f6   :  { %892 = vsyncpa [#allocation7], 1 }
 0x4f7   :  { %894 = vsyncpa [#allocation7 + $0x1], 1 }
 0x4f8   :  { %895 = vsyncpa [#allocation10], 1 }
 0x4f9   :  { %896 = vsyncpa [#allocation5], 1 }
 0x4fa   :  { %898 = vsyncpa [#allocation5 + $0x1], 1 }

</bundles_post_ra>
